<compile_context>
chip_gen: v7x
topology: tpu7x:2x2x1
jax: 0.10.0
libtpu: 0.0.40
codegen_flags: <defaults>
</compile_context>

<pallas_src>
import jax
import jax.numpy as jnp
from jax.experimental import pallas as pl
from jax.experimental.pallas import tpu as pltpu

LATENT_DIM = 100
NUM_CLASSES = 10
EMB_DIM = 10
IN_DIM = LATENT_DIM + EMB_DIM   # 110
H1 = 256
H2 = 512
OUT_DIM = 784                   # 28 * 28


def _round_up(a, m):
    return (a + m - 1) // m * m


def _generator_kernel(z_ref, lbl_ref, w1z_ref, t1_ref, b1_ref,
                      w2_ref, b2_ref, w3_ref, b3_ref, o_ref):
    """Fused embedding-select + 3-layer MLP on one batch tile.

    Layer 1 uses the split form
        h1 = z @ w1[:100] + onehot(labels) @ (emb @ w1[100:110]) + b1
    which is mathematically identical to concat([z, emb[labels]]) @ w1 + b1.
    bf16 matmul inputs, f32 accumulation; LeakyReLU(0.2) / bias / tanh in f32.
    """
    tb = z_ref.shape[0]

    z = z_ref[...].astype(jnp.bfloat16)                       # (tb, 100)
    lbl = lbl_ref[...]                                        # (tb, 1) int32
    cls = jax.lax.broadcasted_iota(jnp.int32, (tb, NUM_CLASSES), 1)
    onehot = (lbl == cls).astype(jnp.bfloat16)                # (tb, 10)

    h1 = (jnp.dot(z, w1z_ref[...], preferred_element_type=jnp.float32)
          + jnp.dot(onehot, t1_ref[...], preferred_element_type=jnp.float32)
          + b1_ref[...])
    h1 = jnp.maximum(h1, 0.2 * h1)                            # LeakyReLU(0.2)

    h2 = jnp.dot(h1.astype(jnp.bfloat16), w2_ref[...],
                 preferred_element_type=jnp.float32) + b2_ref[...]
    h2 = jnp.maximum(h2, 0.2 * h2)                            # LeakyReLU(0.2)

    h3 = jnp.dot(h2.astype(jnp.bfloat16), w3_ref[...],
                 preferred_element_type=jnp.float32) + b3_ref[...]
    o_ref[...] = jnp.tanh(h3).astype(o_ref.dtype)             # (tb, 784)


def init_params(key):
    """Deterministic synthetic parameters matching the PyTorch module shapes (f32)."""
    keys = jax.random.split(key, 7)

    def uniform(k, shape, fan_in):
        bound = 1.0 / jnp.sqrt(fan_in)
        return jax.random.uniform(k, shape, jnp.float32, -bound, bound)

    return {
        "emb": jax.random.normal(keys[0], (NUM_CLASSES, EMB_DIM), jnp.float32),
        "w1": uniform(keys[1], (IN_DIM, H1), IN_DIM),
        "b1": uniform(keys[2], (1, H1), IN_DIM),
        "w2": uniform(keys[3], (H1, H2), H1),
        "b2": uniform(keys[4], (1, H2), H1),
        "w3": uniform(keys[5], (H2, OUT_DIM), H2),
        "b3": uniform(keys[6], (1, OUT_DIM), H2),
    }


def prepare_kernel_params(params):
    """One-time weight preparation for the kernel path.

    * w1 is split: w1_z = w1[:100]  (z path),
      t1  = emb @ w1[100:110]       (embedding path folded through layer 1).
    * Weights cast to bf16 (f32 accumulation in-kernel); biases stay f32.
    """
    w1_z = params["w1"][:LATENT_DIM, :]                        # (100, 256)
    t1 = params["emb"] @ params["w1"][LATENT_DIM:, :]          # (10, 256) exact fold
    return {
        "w1_z": w1_z.astype(jnp.bfloat16),
        "t1": t1.astype(jnp.bfloat16),
        "b1": params["b1"],
        "w2": params["w2"].astype(jnp.bfloat16),
        "b2": params["b2"],
        "w3": params["w3"].astype(jnp.bfloat16),
        "b3": params["b3"],
    }


def generator_forward(kparams, z, labels, *, tb_cap=512, out_dtype=jnp.float32):
    """Full Generator forward. z: (B, 100) f32, labels: (B,) int -> (B,1,28,28).

    tb_cap: batch-tile cap. 512 is safe on all chips (incl. v7x 64 MiB VMEM/TC
    with both cores active); raise to 1024-2048 on v5e/v6e for large-B throughput.
    """
    B = z.shape[0]
    tb = min(tb_cap, _round_up(B, 8))          # multiple of 8, never > ~B
    grid = pl.cdiv(B, tb)                      # partial last tile is masked
    labels2d = labels.reshape(B, 1).astype(jnp.int32)

    def resident(shape):
        # Same block every grid step -> stays VMEM-resident across the batch loop.
        return pl.BlockSpec(shape, lambda i: (0, 0))

    vmem_limit = (64 << 20) if tb > 512 else (32 << 20)

    out = pl.pallas_call(
        _generator_kernel,
        out_shape=jax.ShapeDtypeStruct((B, OUT_DIM), out_dtype),
        grid=(grid,),
        in_specs=[
            pl.BlockSpec((tb, LATENT_DIM), lambda i: (i, 0)),   # z tile walks batch
            pl.BlockSpec((tb, 1), lambda i: (i, 0)),            # labels tile
            resident((LATENT_DIM, H1)),                          # w1_z
            resident((NUM_CLASSES, H1)),                         # t1 = emb @ w1_emb
            resident((1, H1)),                                    # b1
            resident((H1, H2)),                                   # w2
            resident((1, H2)),                                    # b2
            resident((H2, OUT_DIM)),                              # w3
            resident((1, OUT_DIM)),                               # b3
        ],
        out_specs=pl.BlockSpec((tb, OUT_DIM), lambda i: (i, 0)),
        compiler_params=pltpu.CompilerParams(
            dimension_semantics=("parallel",),   # megacore-shard the batch axis
            vmem_limit_bytes=vmem_limit,
        ),
    )(z, labels2d, kparams["w1_z"], kparams["t1"], kparams["b1"],
      kparams["w2"], kparams["b2"], kparams["w3"], kparams["b3"])

    return out.reshape(B, 1, 28, 28)


def _reference_forward(params, z, labels):
    """Pure-JAX f32 reference for correctness checking (mirrors the PyTorch module)."""
    x = jnp.concatenate([z, params["emb"][labels]], axis=1)
    h = x @ params["w1"] + params["b1"]
    h = jnp.where(h > 0, h, 0.2 * h)
    h = h @ params["w2"] + params["b2"]
    h = jnp.where(h > 0, h, 0.2 * h)
    h = h @ params["w3"] + params["b3"]
    return jnp.tanh(h).reshape(z.shape[0], 1, 28, 28)


if __name__ == "__main__":
    key = jax.random.PRNGKey(0)
    k_params, k_z = jax.random.split(key)

    B = 8
    params = init_params(k_params)
    kparams = prepare_kernel_params(params)
    z = jax.random.normal(k_z, (B, LATENT_DIM), jnp.float32)
    labels = jnp.arange(B, dtype=jnp.int32) % NUM_CLASSES

    out = generator_forward(kparams, z, labels)
    out = jax.block_until_ready(out)

    assert out.shape == (B, 1, 28, 28), out.shape
    ref = _reference_forward(params, z, labels)
    # bf16 matmul inputs with f32 accumulation -> allow ~1e-2-level deviation
    # on the tanh-bounded outputs.
    max_err = float(jnp.max(jnp.abs(out - ref)))
    assert max_err < 3e-2, f"mismatch vs reference, max abs err={max_err}"

    print("KERNEL_OK")
</pallas_src>

<mosaic_0001>
module attributes {stable_mosaic.version = 11 : i64} {
  func.func @_generator_kernel(%arg0: i32, %arg1: memref<8x100xf32, #tpu.memory_space<vmem>>, %arg2: memref<8x1xi32, #tpu.memory_space<vmem>>, %arg3: memref<100x256xbf16, #tpu.memory_space<vmem>>, %arg4: memref<10x256xbf16, #tpu.memory_space<vmem>>, %arg5: memref<1x256xf32, #tpu.memory_space<vmem>>, %arg6: memref<256x512xbf16, #tpu.memory_space<vmem>>, %arg7: memref<1x512xf32, #tpu.memory_space<vmem>>, %arg8: memref<512x784xbf16, #tpu.memory_space<vmem>>, %arg9: memref<1x784xf32, #tpu.memory_space<vmem>>, %arg10: memref<8x784xf32, #tpu.memory_space<vmem>>) attributes {dimension_semantics = [#tpu.dimension_semantics<parallel>], iteration_bounds = array<i64: 1>, scalar_prefetch = 0 : i64, scratch_operands = 0 : i64, tpu.core_type = #tpu.core_type<tc>, window_params = [{transform_indices = @transform_0, window_bounds = array<i64: 8, 100>}, {transform_indices = @transform_1, window_bounds = array<i64: 8, 1>}, {pipeline_mode = #tpu.pipeline_mode<synchronous>, transform_indices = @transform_2, window_bounds = array<i64: 100, 256>}, {pipeline_mode = #tpu.pipeline_mode<synchronous>, transform_indices = @transform_3, window_bounds = array<i64: 10, 256>}, {pipeline_mode = #tpu.pipeline_mode<synchronous>, transform_indices = @transform_4, window_bounds = array<i64: 1, 256>}, {pipeline_mode = #tpu.pipeline_mode<synchronous>, transform_indices = @transform_5, window_bounds = array<i64: 256, 512>}, {pipeline_mode = #tpu.pipeline_mode<synchronous>, transform_indices = @transform_6, window_bounds = array<i64: 1, 512>}, {pipeline_mode = #tpu.pipeline_mode<synchronous>, transform_indices = @transform_7, window_bounds = array<i64: 512, 784>}, {pipeline_mode = #tpu.pipeline_mode<synchronous>, transform_indices = @transform_8, window_bounds = array<i64: 1, 784>}, {transform_indices = @transform_9, window_bounds = array<i64: 8, 784>}]} {
    %c0 = arith.constant 0 : index
    %c0_0 = arith.constant 0 : index
    %0 = vector.load %arg1[%c0, %c0_0] : memref<8x100xf32, #tpu.memory_space<vmem>>, vector<8x100xf32>
    %1 = arith.truncf %0 : vector<8x100xf32> to vector<8x100xbf16>
    %c0_1 = arith.constant 0 : index
    %c0_2 = arith.constant 0 : index
    %2 = vector.load %arg2[%c0_1, %c0_2] : memref<8x1xi32, #tpu.memory_space<vmem>>, vector<8x1xi32>
    %3 = tpu.iota {dimensions = array<i32: 1>} : vector<8x10xi32>
    %4 = vector.broadcast %2 : vector<8x1xi32> to vector<8x10xi32>
    %5 = arith.cmpi eq, %4, %3 : vector<8x10xi32>
    %6 = arith.extui %5 : vector<8x10xi1> to vector<8x10xi32>
    %7 = arith.sitofp %6 : vector<8x10xi32> to vector<8x10xf32>
    %8 = arith.truncf %7 : vector<8x10xf32> to vector<8x10xbf16>
    %c0_3 = arith.constant 0 : index
    %c0_4 = arith.constant 0 : index
    %9 = vector.load %arg3[%c0_3, %c0_4] : memref<100x256xbf16, #tpu.memory_space<vmem>>, vector<100x256xbf16>
    %cst = arith.constant dense<0.000000e+00> : vector<8x256xf32>
    %10 = tpu.matmul %1, %9, %cst {dimension_numbers = #tpu.dot_dimension_numbers<[1], [0], [0], [1], [0, 0, 1, 1], [], []>} : vector<8x100xbf16>, vector<100x256xbf16>, vector<8x256xf32> -> vector<8x256xf32>
    %c0_5 = arith.constant 0 : index
    %c0_6 = arith.constant 0 : index
    %11 = vector.load %arg4[%c0_5, %c0_6] : memref<10x256xbf16, #tpu.memory_space<vmem>>, vector<10x256xbf16>
    %cst_7 = arith.constant dense<0.000000e+00> : vector<8x256xf32>
    %12 = tpu.matmul %8, %11, %cst_7 {dimension_numbers = #tpu.dot_dimension_numbers<[1], [0], [0], [1], [0, 0, 1, 1], [], []>} : vector<8x10xbf16>, vector<10x256xbf16>, vector<8x256xf32> -> vector<8x256xf32>
    %13 = arith.addf %10, %12 : vector<8x256xf32>
    %c0_8 = arith.constant 0 : index
    %c0_9 = arith.constant 0 : index
    %14 = vector.load %arg5[%c0_8, %c0_9] : memref<1x256xf32, #tpu.memory_space<vmem>>, vector<1x256xf32>
    %15 = vector.broadcast %14 : vector<1x256xf32> to vector<8x256xf32>
    %16 = arith.addf %13, %15 : vector<8x256xf32>
    %cst_10 = arith.constant 2.000000e-01 : f32
    %17 = vector.broadcast %cst_10 : f32 to vector<8x256xf32>
    %18 = arith.mulf %17, %16 : vector<8x256xf32>
    %19 = arith.maximumf %16, %18 : vector<8x256xf32>
    %20 = arith.truncf %19 : vector<8x256xf32> to vector<8x256xbf16>
    %c0_11 = arith.constant 0 : index
    %c0_12 = arith.constant 0 : index
    %21 = vector.load %arg6[%c0_11, %c0_12] : memref<256x512xbf16, #tpu.memory_space<vmem>>, vector<256x512xbf16>
    %cst_13 = arith.constant dense<0.000000e+00> : vector<8x512xf32>
    %22 = tpu.matmul %20, %21, %cst_13 {dimension_numbers = #tpu.dot_dimension_numbers<[1], [0], [0], [1], [0, 0, 1, 1], [], []>} : vector<8x256xbf16>, vector<256x512xbf16>, vector<8x512xf32> -> vector<8x512xf32>
    %c0_14 = arith.constant 0 : index
    %c0_15 = arith.constant 0 : index
    %23 = vector.load %arg7[%c0_14, %c0_15] : memref<1x512xf32, #tpu.memory_space<vmem>>, vector<1x512xf32>
    %24 = vector.broadcast %23 : vector<1x512xf32> to vector<8x512xf32>
    %25 = arith.addf %22, %24 : vector<8x512xf32>
    %cst_16 = arith.constant 2.000000e-01 : f32
    %26 = vector.broadcast %cst_16 : f32 to vector<8x512xf32>
    %27 = arith.mulf %26, %25 : vector<8x512xf32>
    %28 = arith.maximumf %25, %27 : vector<8x512xf32>
    %29 = arith.truncf %28 : vector<8x512xf32> to vector<8x512xbf16>
    %c0_17 = arith.constant 0 : index
    %c0_18 = arith.constant 0 : index
    %30 = vector.load %arg8[%c0_17, %c0_18] : memref<512x784xbf16, #tpu.memory_space<vmem>>, vector<512x784xbf16>
    %cst_19 = arith.constant dense<0.000000e+00> : vector<8x784xf32>
    %31 = tpu.matmul %29, %30, %cst_19 {dimension_numbers = #tpu.dot_dimension_numbers<[1], [0], [0], [1], [0, 0, 1, 1], [], []>} : vector<8x512xbf16>, vector<512x784xbf16>, vector<8x784xf32> -> vector<8x784xf32>
    %c0_20 = arith.constant 0 : index
    %c0_21 = arith.constant 0 : index
    %32 = vector.load %arg9[%c0_20, %c0_21] : memref<1x784xf32, #tpu.memory_space<vmem>>, vector<1x784xf32>
    %33 = vector.broadcast %32 : vector<1x784xf32> to vector<8x784xf32>
    %34 = arith.addf %31, %33 : vector<8x784xf32>
    %35 = math.tanh %34 : vector<8x784xf32>
    %c0_22 = arith.constant 0 : index
    %c0_23 = arith.constant 0 : index
    %36 = vector.load %arg10[%c0_22, %c0_23] : memref<8x784xf32, #tpu.memory_space<vmem>>, vector<8x784xf32>
    tpu.vector_store %arg10[%c0_22, %c0_23], %35 {strides = array<i32>} : memref<8x784xf32, #tpu.memory_space<vmem>>, vector<8x784xf32>,
    return
  }
  func.func @transform_0(%arg0: i32) -> (i32, i32) {
    %c0_i32 = arith.constant 0 : i32
    %c0_i32_0 = arith.constant 0 : i32
    return %arg0, %c0_i32 : i32, i32
  }
  func.func @transform_1(%arg0: i32) -> (i32, i32) {
    %c0_i32 = arith.constant 0 : i32
    %c0_i32_0 = arith.constant 0 : i32
    return %arg0, %c0_i32 : i32, i32
  }
  func.func @transform_2(%arg0: i32) -> (i32, i32) {
    %c0_i32 = arith.constant 0 : i32
    %c0_i32_0 = arith.constant 0 : i32
    %c0_i32_1 = arith.constant 0 : i32
    return %c0_i32, %c0_i32_0 : i32, i32
  }
  func.func @transform_3(%arg0: i32) -> (i32, i32) {
    %c0_i32 = arith.constant 0 : i32
    %c0_i32_0 = arith.constant 0 : i32
    %c0_i32_1 = arith.constant 0 : i32
    return %c0_i32, %c0_i32_0 : i32, i32
  }
  func.func @transform_4(%arg0: i32) -> (i32, i32) {
    %c0_i32 = arith.constant 0 : i32
    %c0_i32_0 = arith.constant 0 : i32
    %c0_i32_1 = arith.constant 0 : i32
    return %c0_i32, %c0_i32_0 : i32, i32
  }
  func.func @transform_5(%arg0: i32) -> (i32, i32) {
    %c0_i32 = arith.constant 0 : i32
    %c0_i32_0 = arith.constant 0 : i32
    %c0_i32_1 = arith.constant 0 : i32
    return %c0_i32, %c0_i32_0 : i32, i32
  }
  func.func @transform_6(%arg0: i32) -> (i32, i32) {
    %c0_i32 = arith.constant 0 : i32
    %c0_i32_0 = arith.constant 0 : i32
    %c0_i32_1 = arith.constant 0 : i32
    return %c0_i32, %c0_i32_0 : i32, i32
  }
  func.func @transform_7(%arg0: i32) -> (i32, i32) {
    %c0_i32 = arith.constant 0 : i32
    %c0_i32_0 = arith.constant 0 : i32
    %c0_i32_1 = arith.constant 0 : i32
    return %c0_i32, %c0_i32_0 : i32, i32
  }
  func.func @transform_8(%arg0: i32) -> (i32, i32) {
    %c0_i32 = arith.constant 0 : i32
    %c0_i32_0 = arith.constant 0 : i32
    %c0_i32_1 = arith.constant 0 : i32
    return %c0_i32, %c0_i32_0 : i32, i32
  }
  func.func @transform_9(%arg0: i32) -> (i32, i32) {
    %c0_i32 = arith.constant 0 : i32
    %c0_i32_0 = arith.constant 0 : i32
    return %arg0, %c0_i32 : i32, i32
  }
}

</mosaic_0001>

<bundles_post_ra>
// kernel: tpu_custom_call.1
= control target key start
LH: loop header
LB: loop body
LE: loop exit
PB: predicated region body
PF: predicated region fallthrough
CT: control target
= control target key end

     0   :  { %vm73_vm0 = vcmask 1044480   ;;  %v3410_v1 = vmov 0   ;;  %v37_v18 = vlaneseq  ;;  %s4461_s0 = inlined_call_operand.vmem [shape: f32[8,100], index: 0, kind: input, shape index: {}]   ;;  %s4462_s1 = inlined_call_operand.vmem [shape: s32[8,1], index: 1, kind: input, shape index: {}]   ;;  %s4463_s2 = inlined_call_operand.vmem [shape: bf16[100,256], index: 2, kind: input, shape index: {}]   ;;  %s4464_s3 = inlined_call_operand.vmem [shape: bf16[10,256], index: 3, kind: input, shape index: {}]   ;;  %s4465_s4 = inlined_call_operand.vmem [shape: f32[1,256], index: 4, kind: input, shape index: {}]   ;;  %s4466_s5 = inlined_call_operand.vmem [shape: bf16[256,512], index: 5, kind: input, shape index: {}]   ;;  %s4467_s6 = inlined_call_operand.vmem [shape: f32[1,512], index: 6, kind: input, shape index: {}]   ;;  %s4468_s7 = inlined_call_operand.vmem [shape: bf16[512,784], index: 7, kind: input, shape index: {}]   ;;  %s4469_s8 = inlined_call_operand.vmem [shape: f32[1,784], index: 8, kind: input, shape index: {}]   ;;  %s4470_s9 = inlined_call_operand.hbm [shape: f32[8,784], index: 9, kind: output, shape index: {}]  }
   0x1   :  { %v36_v0 = vld [vmem:[%s4462_s1] sm:$0xff]  ;;  %2932 = vset.pattern.permute.xlu0 %v3410_v1  ;;  %112 = vmatprep.mubr.bf16.mxu1 %v3410_v1 }
   0x2   :  { %v2933_v2 = vld [vmem:[%s4464_s3 + $0x4] ss:$8 sps:$4 sm:$0x1f]   ;;  %40 = vperm.xlu0 %2932, %v36_v0   ;;  %v2935_v3 = vld [vmem:[%s4464_s3] ss:$8 sps:$4 sm:$0x1f]  }
   0x3   :  { %2561 = vmatprep.subr.msk.bf16.mxu1 %vm73_vm0, %v2933_v2  ;;  %v2938_v4 = vld [vmem:[%s4463_s2 + $0x4] ss:$8 sps:$4 sm:$0xff]   ;;  %v75_v5 = vsel %vm73_vm0, %v2935_v3, 0  ;;  %v2961_v7 = vld [vmem:[%s4466_s5] ss:$16 sps:$4 sm:$0xff]  }
   0x4   :  { %81 = vmatpush1.bf16.msra.mxu1 %v75_v5  ;;  %v2956_v6 = vld [vmem:[%s4466_s5 + $0x4] ss:$16 sps:$4 sm:$0xff]   ;;  %v2967_v9 = vld [vmem:[%s4466_s5 + $0x20] ss:$16 sps:$4 sm:$0xff]  }
   0x5   :  { %197 = vmatprep.subr.bf16.mxu1 %v2938_v4  ;;  %v2962_v8 = vld [vmem:[%s4466_s5 + $0x24] ss:$16 sps:$4 sm:$0xff]   ;;  %664 = vmatprep.subr.bf16.mxu0 %v2956_v6  ;;  %v2973_v11 = vld [vmem:[%s4466_s5 + $0x40] ss:$16 sps:$4 sm:$0xff]  }
   0x6   :  { %665 = vmatpush1.bf16.msra.mxu0 %v2961_v7  ;;  %v2968_v10 = vld [vmem:[%s4466_s5 + $0x44] ss:$16 sps:$4 sm:$0xff]   ;;  %v2979_v13 = vld [vmem:[%s4466_s5 + $0x60] ss:$16 sps:$4 sm:$0xff]  }
   0x7   :  { %666 = vmatprep.subr.bf16.mxu0 %v2962_v8  ;;  %v2974_v12 = vld [vmem:[%s4466_s5 + $0x64] ss:$16 sps:$4 sm:$0xff]   ;;  %v2985_v15 = vld [vmem:[%s4466_s5 + $0x80] ss:$16 sps:$4 sm:$0xff]  }
   0x8   :  { %v2980_v14 = vld [vmem:[%s4466_s5 + $0x84] ss:$16 sps:$4 sm:$0xff]   ;;  %v2991_v17 = vld [vmem:[%s4466_s5 + $0xa0] ss:$16 sps:$4 sm:$0xff]  }
   0x9   :  { %v2986_v16 = vld [vmem:[%s4466_s5 + $0xa4] ss:$16 sps:$4 sm:$0xff]  }
   0xa   :  { %667 = vmatpush1.bf16.msra.mxu0 %v2967_v9 }
   0xb   :  { %668 = vmatprep.subr.bf16.mxu0 %v2968_v10 }
   0xe   :  { %669 = vmatpush1.bf16.msra.mxu0 %v2973_v11 }
   0xf   :  { %670 = vmatprep.subr.bf16.mxu0 %v2974_v12 }
  0x12   :  { %671 = vmatpush1.bf16.msra.mxu0 %v2979_v13 }
  0x13   :  { %672 = vmatprep.subr.bf16.mxu0 %v2980_v14 }
  0x16   :  { %673 = vmatpush1.bf16.msra.mxu0 %v2985_v15 }
  0x17   :  { %674 = vmatprep.subr.bf16.mxu0 %v2986_v16 }
  0x1a   :  { %675 = vmatpush1.bf16.msra.mxu0 %v2991_v17 }
  0x1b   :  { %14 = vsyncpa [#allocation3], 0  ;;  %v38_v19 = vand.u32 127, %v37_v18  ;;  %v3411_v21 = vmov 0.0   ;;  %v2936_v23 = vld [vmem:[%s4463_s2] ss:$8 sps:$4 sm:$0xff]  }
  0x1c   :  { %vm69_vm2 = vcmask 80896   ;;  %v2941_v25 = vld [vmem:[%s4463_s2 + $0x14] ss:$8 sps:$4 sm:$0xff]   ;;  %v2939_v26 = vld [vmem:[%s4463_s2 + $0x10] ss:$8 sps:$4 sm:$0xff]   ;;  %vm190_vm3 = vcmask 1041408  }
  0x1d   :  { %v2944_v27 = vld [vmem:[%s4463_s2 + $0x24] ss:$8 sps:$4 sm:$0xff]   ;;  %v2942_v28 = vld [vmem:[%s4463_s2 + $0x20] ss:$8 sps:$4 sm:$0xff]   ;;  %v2947_v29 = vld [vmem:[%s4463_s2 + $0x34] ss:$8 sps:$4 sm:$0xff]  }
  0x1e   :  { %v2945_v30 = vld [vmem:[%s4463_s2 + $0x30] ss:$8 sps:$4 sm:$0xff]   ;;  %v2950_v31 = vld [vmem:[%s4463_s2 + $0x44] ss:$8 sps:$4 sm:$0xff]   ;;  %v2948_v32 = vld [vmem:[%s4463_s2 + $0x40] ss:$8 sps:$4 sm:$0xff]  }
  0x1f   :  { %v2953_v33 = vld [vmem:[%s4463_s2 + $0x54] ss:$8 sps:$4 sm:$0xff]   ;;  %v58_v34 = vld [vmem:[%s4463_s2 + $0x60] sm:$0x33]  ;;  %v2951_v35 = vld [vmem:[%s4463_s2 + $0x50] ss:$8 sps:$4 sm:$0xff]  }
  0x20   :  { %v2576_v36 = vcombine.high %v58_v34, %v58_v34  ;;  %v2575_v37 = vcombine.low %v58_v34, %v58_v34  ;;  %v34_v38 = vld [vmem:[%s4461_s0] sm:$0xff]  ;;  %v2960_v40 = vld [vmem:[%s4466_s5 + $0xc] ss:$16 sps:$4 sm:$0xff]   ;;  %vm186_vm4 = vcmask 818176   ;;  %v2958_v42 = vld [vmem:[%s4466_s5 + $0x8] ss:$16 sps:$4 sm:$0xff]  }
  0x21   :  { %v35_v41 = vpack.c.bf16 %v34_v38, %v34_v38  ;;  %v2966_v43 = vld [vmem:[%s4466_s5 + $0x2c] ss:$16 sps:$4 sm:$0xff]   ;;  %v2964_v44 = vld [vmem:[%s4466_s5 + $0x28] ss:$16 sps:$4 sm:$0xff]   ;;  %v2992_v53 = vld [vmem:[%s4466_s5 + $0xc4] ss:$16 sps:$4 sm:$0xff]  }
  0x22   :  { %v192_v39 = vsel %vm190_vm3, %v2575_v37, 0  ;;  %v2972_v45 = vld [vmem:[%s4466_s5 + $0x4c] ss:$16 sps:$4 sm:$0xff]   ;;  %v2970_v46 = vld [vmem:[%s4466_s5 + $0x48] ss:$16 sps:$4 sm:$0xff]   ;;  %676 = vmatprep.subr.bf16.mxu0 %v2992_v53  ;;  %vm2542_vm5 = vcmask 130048  }
  0x23   :  { %v2978_v47 = vld [vmem:[%s4466_s5 + $0x6c] ss:$16 sps:$4 sm:$0xff]   ;;  %v2976_v48 = vld [vmem:[%s4466_s5 + $0x68] ss:$16 sps:$4 sm:$0xff]   ;;  %v2997_v56 = vld [vmem:[%s4466_s5 + $0xc0] ss:$16 sps:$4 sm:$0xff]  }
  0x24   :  { %v2984_v49 = vld [vmem:[%s4466_s5 + $0x8c] ss:$16 sps:$4 sm:$0xff]   ;;  %v2982_v50 = vld [vmem:[%s4466_s5 + $0x88] ss:$16 sps:$4 sm:$0xff]   ;;  %677 = vmatpush1.bf16.msra.mxu0 %v2997_v56  ;;  %v2998_v57 = vld [vmem:[%s4466_s5 + $0xe4] ss:$16 sps:$4 sm:$0xff]  }
  0x25   :  { %v2990_v51 = vld [vmem:[%s4466_s5 + $0xac] ss:$16 sps:$4 sm:$0xff]   ;;  %v2988_v52 = vld [vmem:[%s4466_s5 + $0xa8] ss:$16 sps:$4 sm:$0xff]   ;;  %v3003_v60 = vld [vmem:[%s4466_s5 + $0xe0] ss:$16 sps:$4 sm:$0xff]   ;;  %678 = vmatprep.subr.bf16.mxu0 %v2998_v57 }
  0x26   :  { %v2996_v54 = vld [vmem:[%s4466_s5 + $0xcc] ss:$16 sps:$4 sm:$0xff]   ;;  %v2994_v55 = vld [vmem:[%s4466_s5 + $0xc8] ss:$16 sps:$4 sm:$0xff]   ;;  %v3004_v61 = vld [vmem:[%s4466_s5 + $0x104] ss:$16 sps:$4 sm:$0xff]  }
  0x27   :  { %v3000_v58 = vld [vmem:[%s4466_s5 + $0xe8] ss:$16 sps:$4 sm:$0xff]   ;;  %v3002_v59 = vld [vmem:[%s4466_s5 + $0xec] ss:$16 sps:$4 sm:$0xff]   ;;  %v3009_v0 = vld [vmem:[%s4466_s5 + $0x100] ss:$16 sps:$4 sm:$0xff]  }
  0x28   :  { %v3008_v62 = vld [vmem:[%s4466_s5 + $0x10c] ss:$16 sps:$4 sm:$0xff]   ;;  %679 = vmatpush1.bf16.msra.mxu0 %v3003_v60  ;;  %v3006_v63 = vld [vmem:[%s4466_s5 + $0x108] ss:$16 sps:$4 sm:$0xff]   ;;  %v3015_v4 = vld [vmem:[%s4466_s5 + $0x120] ss:$16 sps:$4 sm:$0xff]  }
  0x29   :  { %680 = vmatprep.subr.bf16.mxu0 %v3004_v61  ;;  %v3014_v2 = vld [vmem:[%s4466_s5 + $0x12c] ss:$16 sps:$4 sm:$0xff]   ;;  %v3012_v3 = vld [vmem:[%s4466_s5 + $0x128] ss:$16 sps:$4 sm:$0xff]   ;;  %v3016_v5 = vld [vmem:[%s4466_s5 + $0x144] ss:$16 sps:$4 sm:$0xff]  }
  0x2a   :  { %v3020_v6 = vld [vmem:[%s4466_s5 + $0x14c] ss:$16 sps:$4 sm:$0xff]   ;;  %v3018_v7 = vld [vmem:[%s4466_s5 + $0x148] ss:$16 sps:$4 sm:$0xff]   ;;  %v3021_v8 = vld [vmem:[%s4466_s5 + $0x140] ss:$16 sps:$4 sm:$0xff]  }
  0x2b   :  { %v3022_v9 = vld [vmem:[%s4466_s5 + $0x164] ss:$16 sps:$4 sm:$0xff]   ;;  %v3026_v10 = vld [vmem:[%s4466_s5 + $0x16c] ss:$16 sps:$4 sm:$0xff]   ;;  %v3024_v11 = vld [vmem:[%s4466_s5 + $0x168] ss:$16 sps:$4 sm:$0xff]  }
  0x2c   :  { %681 = vmatpush1.bf16.msra.mxu0 %v3009_v0  ;;  %v3027_v12 = vld [vmem:[%s4466_s5 + $0x160] ss:$16 sps:$4 sm:$0xff]   ;;  %v3028_v13 = vld [vmem:[%s4466_s5 + $0x184] ss:$16 sps:$4 sm:$0xff]   ;;  %v3032_v14 = vld [vmem:[%s4466_s5 + $0x18c] ss:$16 sps:$4 sm:$0xff]  }
  0x2d   :  { %v3030_v15 = vld [vmem:[%s4466_s5 + $0x188] ss:$16 sps:$4 sm:$0xff]   ;;  %v3033_v16 = vld [vmem:[%s4466_s5 + $0x180] ss:$16 sps:$4 sm:$0xff]   ;;  %v3034_v17 = vld [vmem:[%s4466_s5 + $0x1a4] ss:$16 sps:$4 sm:$0xff]  }
  0x2e   :  { %v238_v38 = vld [vmem:[%s4465_s4] sm:$0x3]  ;;  %v3060_v57 = vld [vmem:[%s4468_s7 + $0x3c] ss:$28 sps:$4 sm:$0xff]   ;;  %v3066_v61 = vld [vmem:[%s4468_s7 + $0x74] ss:$28 sps:$4 sm:$0xff]  }
  0x2f   :  { %v3061_v60 = vld [vmem:[%s4468_s7 + $0x40] ss:$28 sps:$4 sm:$0xff]   ;;  %v3067_v0 = vld [vmem:[%s4468_s7 + $0x78] ss:$28 sps:$4 sm:$0xff]  }
  0x81   :  { %v41_v20 = vpop.permute.xlu0 %40 }
  0x82   :  { %vm42_vm1 = vcmp.eq.s32.totalorder %v41_v20, %v38_v19  ;;  %v3038_v19 = vld [vmem:[%s4466_s5 + $0x1ac] ss:$16 sps:$4 sm:$0xff]   ;;  %v3036_v20 = vld [vmem:[%s4466_s5 + $0x1a8] ss:$16 sps:$4 sm:$0xff]  }
  0x83   :  { %v2558_v22 = vsel %vm42_vm1, 1.0, %v3411_v21  ;;  %v3039_v21 = vld [vmem:[%s4466_s5 + $0x1a0] ss:$16 sps:$4 sm:$0xff]  }
  0x84   :  { %v45_v24 = vpack.c.bf16 %v2558_v22, %v2558_v22  ;;  %v3040_v22 = vld [vmem:[%s4466_s5 + $0x1c4] ss:$16 sps:$4 sm:$0xff]  }
  0x86   :  { %2562 = vmatmul.mubr.msk.bf16.vlgmr.msra.gmra.mrb[0].mxu1 %vm69_vm2, %v45_v24  ;;  %v3042_v24 = vld [vmem:[%s4466_s5 + $0x1c8] ss:$16 sps:$4 sm:$0xff]  }
  0x87   :  { %198 = vmatpush1.bf16.msra.mxu1 %v2936_v23  ;;  %229 = vmatprep.mubr.bf16.mxu1 %v3410_v1  ;;  %v3010_v1 = vld [vmem:[%s4466_s5 + $0x124] ss:$16 sps:$4 sm:$0xff]   ;;  %v3044_v23 = vld [vmem:[%s4466_s5 + $0x1cc] ss:$16 sps:$4 sm:$0xff]  }
  0x88   :  { %199 = vmatprep.subr.bf16.mxu1 %v2941_v25  ;;  %682 = vmatprep.subr.bf16.mxu0 %v3010_v1  ;;  %v3045_v25 = vld [vmem:[%s4466_s5 + $0x1c0] ss:$16 sps:$4 sm:$0xff]   ;;  %v3072_v1 = vld [vmem:[%s4468_s7 + $0xac] ss:$28 sps:$4 sm:$0xff]  }
  0x89   :  { %683 = vmatpush1.bf16.msra.mxu0 %v3015_v4  ;;  %v3073_v4 = vld [vmem:[%s4468_s7 + $0xb0] ss:$28 sps:$4 sm:$0xff]  }
  0x8a   :  { %684 = vmatprep.subr.bf16.mxu0 %v3016_v5  ;;  %v3078_v5 = vld [vmem:[%s4468_s7 + $0xe4] ss:$28 sps:$4 sm:$0xff]  }
  0x8b   :  { %200 = vmatpush1.bf16.msra.mxu1 %v2939_v26  ;;  %v3046_v26 = vld [vmem:[%s4466_s5 + $0x1e4] ss:$16 sps:$4 sm:$0xff]  }
  0x8c   :  { %201 = vmatprep.subr.bf16.mxu1 %v2944_v27  ;;  %v3050_v27 = vld [vmem:[%s4466_s5 + $0x1ec] ss:$16 sps:$4 sm:$0xff]  }
  0x8d   :  { %685 = vmatpush1.bf16.msra.mxu0 %v3021_v8  ;;  %v3079_v8 = vld [vmem:[%s4468_s7 + $0xe8] ss:$28 sps:$4 sm:$0xff]  }
  0x8e   :  { %686 = vmatprep.subr.bf16.mxu0 %v3022_v9  ;;  %v3084_v9 = vld [vmem:[%s4468_s7 + $0x11c] ss:$28 sps:$4 sm:$0xff]  }
  0x8f   :  { %202 = vmatpush1.bf16.msra.mxu1 %v2942_v28  ;;  %v3048_v28 = vld [vmem:[%s4466_s5 + $0x1e8] ss:$16 sps:$4 sm:$0xff]  }
  0x90   :  { %203 = vmatprep.subr.bf16.mxu1 %v2947_v29  ;;  %v3051_v29 = vld [vmem:[%s4466_s5 + $0x1e0] ss:$16 sps:$4 sm:$0xff]  }
  0x91   :  { %687 = vmatpush1.bf16.msra.mxu0 %v3027_v12  ;;  %v3085_v12 = vld [vmem:[%s4468_s7 + $0x120] ss:$28 sps:$4 sm:$0xff]  }
  0x92   :  { %688 = vmatprep.subr.bf16.mxu0 %v3028_v13  ;;  %v3090_v13 = vld [vmem:[%s4468_s7 + $0x154] ss:$28 sps:$4 sm:$0xff]  }
  0x93   :  { %204 = vmatpush1.bf16.msra.mxu1 %v2945_v30  ;;  %v3054_v30 = vld [vmem:[%s4468_s7 + $0x4] ss:$28 sps:$4 sm:$0xff]  }
  0x94   :  { %205 = vmatprep.subr.bf16.mxu1 %v2950_v31  ;;  %v3057_v31 = vld [vmem:[%s4468_s7 + $0xc] ss:$28 sps:$4 sm:$0xff]  }
  0x95   :  { %689 = vmatpush1.bf16.msra.mxu0 %v3033_v16  ;;  %v3091_v16 = vld [vmem:[%s4468_s7 + $0x158] ss:$28 sps:$4 sm:$0xff]  }
  0x96   :  { %690 = vmatprep.subr.bf16.mxu0 %v3034_v17  ;;  %v3096_v17 = vld [vmem:[%s4468_s7 + $0x18c] ss:$28 sps:$4 sm:$0xff]  }
  0x97   :  { %206 = vmatpush1.bf16.msra.mxu1 %v2948_v32 }
  0x98   :  { %207 = vmatprep.subr.bf16.mxu1 %v2953_v33 }
  0x99   :  { %691 = vmatpush1.bf16.msra.mxu0 %v3039_v21  ;;  %v3097_v21 = vld [vmem:[%s4468_s7 + $0x190] ss:$28 sps:$4 sm:$0xff]  }
  0x9a   :  { %692 = vmatprep.subr.bf16.mxu0 %v3040_v22  ;;  %v3102_v22 = vld [vmem:[%s4468_s7 + $0x1c4] ss:$28 sps:$4 sm:$0xff]  }
  0x9b   :  { %208 = vmatpush1.bf16.msra.mxu1 %v2951_v35 }
  0x9c   :  { %2577 = vmatprep.subr.msk.bf16.mxu1 %vm190_vm3, %v2576_v36  ;;  %v3714_v36 = vshrl.u32 %v37_v18, 7 }
  0x9d   :  { %693 = vmatpush1.bf16.msra.mxu0 %v3045_v25  ;;  %v3103_v25 = vld [vmem:[%s4468_s7 + $0x1c8] ss:$28 sps:$4 sm:$0xff]  }
  0x9e   :  { %694 = vmatprep.subr.bf16.mxu0 %v3046_v26  ;;  %v3717_v37 = vsub.s32 0, %v3714_v36  ;;  %v3108_v26 = vld [vmem:[%s4468_s7 + $0x1fc] ss:$28 sps:$4 sm:$0xff]  }
  0x9f   :  { %210 = vmatpush1.bf16.msra.mxu1 %v192_v39  ;;  %v3723_v39 = vsub.s32 1, %v3714_v36 }
  0xa0   :  { %705 = vmatprep.subr.bf16.mxu1 %v2960_v40  ;;  %v243_v40 = vrot.slane %v238_v38, %v3717_v37 }
  0xa1   :  { %695 = vmatpush1.bf16.msra.mxu0 %v3051_v29  ;;  %v3109_v29 = vld [vmem:[%s4468_s7 + $0x200] ss:$28 sps:$4 sm:$0xff]  }
  0xa2   :  { %2578 = vmatmul.mubr.msk.bf16.vlgmr.msra.gmra.mrb[4].mxu1 %vm186_vm4, %v35_v41  ;;  %2203 = vmatprep.subr.bf16.mxu0 %v3054_v30  ;;  %v3114_v30 = vld [vmem:[%s4468_s7 + $0x234] ss:$28 sps:$4 sm:$0xff]  }
  0xa3   :  { %706 = vmatpush1.bf16.msra.mxu1 %v2958_v42  ;;  %v247_v42 = vrot.slane %v238_v38, %v3723_v39  ;;  %v3118_v38 = vld [vmem:[%s4468_s7 + $0x268] ss:$28 sps:$4 sm:$0xff]  }
  0xa4   :  { %707 = vmatprep.subr.bf16.mxu1 %v2966_v43 }
  0xa7   :  { %708 = vmatpush1.bf16.msra.mxu1 %v2964_v44 }
  0xa8   :  { %709 = vmatprep.subr.bf16.mxu1 %v2972_v45 }
  0xab   :  { %710 = vmatpush1.bf16.msra.mxu1 %v2970_v46 }
  0xac   :  { %711 = vmatprep.subr.bf16.mxu1 %v2978_v47 }
  0xaf   :  { %712 = vmatpush1.bf16.msra.mxu1 %v2976_v48 }
  0xb0   :  { %713 = vmatprep.subr.bf16.mxu1 %v2984_v49 }
  0xb3   :  { %714 = vmatpush1.bf16.msra.mxu1 %v2982_v50 }
  0xb4   :  { %715 = vmatprep.subr.bf16.mxu1 %v2990_v51 }
  0xb7   :  { %716 = vmatpush1.bf16.msra.mxu1 %v2988_v52 }
  0xb8   :  { %717 = vmatprep.subr.bf16.mxu1 %v2996_v54  ;;  %v3052_v54 = vld [vmem:[%s4468_s7] ss:$28 sps:$4 sm:$0xff]  }
  0xbb   :  { %718 = vmatpush1.bf16.msra.mxu1 %v2994_v55  ;;  %v3055_v55 = vld [vmem:[%s4468_s7 + $0x8] ss:$28 sps:$4 sm:$0xff]  }
  0xbc   :  { %719 = vmatprep.subr.bf16.mxu1 %v3002_v59  ;;  %v3058_v59 = vld [vmem:[%s4468_s7 + $0x38] ss:$28 sps:$4 sm:$0xff]  }
  0xbf   :  { %720 = vmatpush1.bf16.msra.mxu1 %v3000_v58  ;;  %v3063_v58 = vld [vmem:[%s4468_s7 + $0x44] ss:$28 sps:$4 sm:$0xff]  }
  0xc0   :  { %721 = vmatprep.subr.bf16.mxu1 %v3008_v62  ;;  %v3069_v62 = vld [vmem:[%s4468_s7 + $0x7c] ss:$28 sps:$4 sm:$0xff]  }
  0xc3   :  { %722 = vmatpush1.bf16.msra.mxu1 %v3006_v63  ;;  %v3064_v63 = vld [vmem:[%s4468_s7 + $0x70] ss:$28 sps:$4 sm:$0xff]  }
  0xc4   :  { %723 = vmatprep.subr.bf16.mxu1 %v3014_v2  ;;  %v3075_v2 = vld [vmem:[%s4468_s7 + $0xb4] ss:$28 sps:$4 sm:$0xff]  }
  0xc7   :  { %724 = vmatpush1.bf16.msra.mxu1 %v3012_v3  ;;  %v3070_v3 = vld [vmem:[%s4468_s7 + $0xa8] ss:$28 sps:$4 sm:$0xff]  }
  0xc8   :  { %725 = vmatprep.subr.bf16.mxu1 %v3020_v6  ;;  %v3081_v6 = vld [vmem:[%s4468_s7 + $0xec] ss:$28 sps:$4 sm:$0xff]  }
  0xcb   :  { %726 = vmatpush1.bf16.msra.mxu1 %v3018_v7  ;;  %v3076_v7 = vld [vmem:[%s4468_s7 + $0xe0] ss:$28 sps:$4 sm:$0xff]  }
  0xcc   :  { %727 = vmatprep.subr.bf16.mxu1 %v3026_v10  ;;  %v3087_v10 = vld [vmem:[%s4468_s7 + $0x124] ss:$28 sps:$4 sm:$0xff]  }
  0xcf   :  { %728 = vmatpush1.bf16.msra.mxu1 %v3024_v11  ;;  %v3082_v11 = vld [vmem:[%s4468_s7 + $0x118] ss:$28 sps:$4 sm:$0xff]  }
  0xd0   :  { %729 = vmatprep.subr.bf16.mxu1 %v3032_v14  ;;  %v3093_v14 = vld [vmem:[%s4468_s7 + $0x15c] ss:$28 sps:$4 sm:$0xff]  }
  0xd3   :  { %730 = vmatpush1.bf16.msra.mxu1 %v3030_v15  ;;  %v3088_v15 = vld [vmem:[%s4468_s7 + $0x150] ss:$28 sps:$4 sm:$0xff]  }
  0xd4   :  { %731 = vmatprep.subr.bf16.mxu1 %v3038_v19  ;;  %v3099_v19 = vld [vmem:[%s4468_s7 + $0x194] ss:$28 sps:$4 sm:$0xff]  }
  0xd7   :  { %732 = vmatpush1.bf16.msra.mxu1 %v3036_v20  ;;  %v3094_v20 = vld [vmem:[%s4468_s7 + $0x188] ss:$28 sps:$4 sm:$0xff]  }
  0xd8   :  { %733 = vmatprep.subr.bf16.mxu1 %v3044_v23  ;;  %v3105_v23 = vld [vmem:[%s4468_s7 + $0x1cc] ss:$28 sps:$4 sm:$0xff]  }
  0xdb   :  { %734 = vmatpush1.bf16.msra.mxu1 %v3042_v24  ;;  %v3100_v24 = vld [vmem:[%s4468_s7 + $0x1c0] ss:$28 sps:$4 sm:$0xff]  }
  0xdc   :  { %735 = vmatprep.subr.bf16.mxu1 %v3050_v27  ;;  %v3111_v27 = vld [vmem:[%s4468_s7 + $0x204] ss:$28 sps:$4 sm:$0xff]  }
  0xdf   :  { %736 = vmatpush1.bf16.msra.mxu1 %v3048_v28  ;;  %v3106_v28 = vld [vmem:[%s4468_s7 + $0x1f8] ss:$28 sps:$4 sm:$0xff]  }
  0xe0   :  { %2285 = vmatprep.subr.bf16.mxu1 %v3057_v31  ;;  %v3117_v31 = vld [vmem:[%s4468_s7 + $0x23c] ss:$28 sps:$4 sm:$0xff]  }
 0x159   :  { %v114_v32 = vpop.f32.mrb[0].mxu1 }
 0x15a   :  { %v116_v33 = vpop.f32.mrb[1].mxu1 }
 0x15b   :  { %v118_v34 = vpop.f32.mrb[2].mxu1 }
 0x15c   :  { %v119_v35 = vpop.f32.mrb[3].mxu1  ;;  %v3120_v34 = vld [vmem:[%s4468_s7 + $0x26c] ss:$28 sps:$4 sm:$0xff]  }
 0x15d   :  { %v3123_v35 = vld [vmem:[%s4468_s7 + $0x274] ss:$28 sps:$4 sm:$0xff]  }
 0x175   :  { %v231_v41 = vpop.f32.mrb[4].mxu1 }
 0x176   :  { %v232_v43 = vadd.f32 %v231_v41, %v114_v32  ;;  %v233_v44 = vpop.f32.mrb[5].mxu1  ;;  %v3112_v32 = vld [vmem:[%s4468_s7 + $0x230] ss:$28 sps:$4 sm:$0xff]   ;;  %v3126_v41 = vld [vmem:[%s4468_s7 + $0x2a4] ss:$28 sps:$4 sm:$0xff]  }
 0x177   :  { %v234_v45 = vadd.f32 %v233_v44, %v116_v33  ;;  %v235_v18 = vpop.f32.mrb[6].mxu1  ;;  %v3115_v33 = vld [vmem:[%s4468_s7 + $0x238] ss:$28 sps:$4 sm:$0xff]   ;;  %v3127_v44 = vld [vmem:[%s4468_s7 + $0x2a8] ss:$28 sps:$4 sm:$0xff]  }
 0x178   :  { %v250_v46 = vadd.f32 %v243_v40, %v232_v43  ;;  %v236_v47 = vpop.f32.mrb[7].mxu1  ;;  %v3121_v40 = vld [vmem:[%s4468_s7 + $0x270] ss:$28 sps:$4 sm:$0xff]   ;;  %v3124_v43 = vld [vmem:[%s4468_s7 + $0x2a0] ss:$28 sps:$4 sm:$0xff]  }
 0x179   :  { %v251_v48 = vadd.f32 %v247_v42, %v234_v45  ;;  %v3129_v42 = vld [vmem:[%s4468_s7 + $0x2ac] ss:$28 sps:$4 sm:$0xff]   ;;  %v3132_v45 = vld [vmem:[%s4468_s7 + $0x2dc] ss:$28 sps:$4 sm:$0xff]   ;;  %v3135_v18 = vld [vmem:[%s4468_s7 + $0x2e4] ss:$28 sps:$4 sm:$0xff]  }
 0x17a   :  { %v252_v49 = vmul.f32 0.2, %v250_v46  ;;  %v3133_v47 = vld [vmem:[%s4468_s7 + $0x2e0] ss:$28 sps:$4 sm:$0xff]  }
 0x17b   :  { %v253_v50 = vmul.f32 0.2, %v251_v48 }
 0x17c   :  { %v254_v51 = vmax.f32 %v250_v46, %v252_v49  ;;  %v3130_v46 = vld [vmem:[%s4468_s7 + $0x2d8] ss:$28 sps:$4 sm:$0xff]  }
 0x17d   :  { %v255_v52 = vmax.f32 %v251_v48, %v253_v50  ;;  %v3138_v48 = vld [vmem:[%s4468_s7 + $0x314] ss:$28 sps:$4 sm:$0xff]   ;;  %v3141_v49 = vld [vmem:[%s4468_s7 + $0x31c] ss:$28 sps:$4 sm:$0xff]  }
 0x17e   :  { %v256_v56 = vpack.c.bf16 %v254_v51, %v254_v51  ;;  %v3136_v50 = vld [vmem:[%s4468_s7 + $0x310] ss:$28 sps:$4 sm:$0xff]   ;;  %v3139_v51 = vld [vmem:[%s4468_s7 + $0x318] ss:$28 sps:$4 sm:$0xff]  }
 0x17f   :  { %v257_v53 = vpack.c.bf16 %v255_v52, %v255_v52  ;;  %v3144_v52 = vld [vmem:[%s4468_s7 + $0x34c] ss:$28 sps:$4 sm:$0xff]  }
 0x181   :  { %696 = vmatprep.mubr.bf16.mxu0 %v257_v53  ;;  %737 = vmatprep.mubr.bf16.mxu1 %v257_v53  ;;  %v3147_v53 = vld [vmem:[%s4468_s7 + $0x354] ss:$28 sps:$4 sm:$0xff]  }
 0x182   :  { %697 = vmatmul.mubr.bf16.vlgmr.msra.gmra.mrb[0].mxu0 %v256_v56  ;;  %738 = vmatmul.mubr.bf16.vlgmr.msra.gmra.mrb[8].mxu1 %v256_v56  ;;  %v3150_v56 = vld [vmem:[%s4468_s7 + $0x384] ss:$28 sps:$4 sm:$0xff]  }
 0x183   :  { %2204 = vmatpush1.bf16.msra.mxu0 %v3052_v54  ;;  %2286 = vmatpush1.bf16.msra.mxu1 %v3055_v55  ;;  %v3142_v54 = vld [vmem:[%s4468_s7 + $0x348] ss:$28 sps:$4 sm:$0xff]   ;;  %v3145_v55 = vld [vmem:[%s4468_s7 + $0x350] ss:$28 sps:$4 sm:$0xff]  }
 0x184   :  { %2205 = vmatprep.subr.bf16.mxu0 %v3060_v57  ;;  %2287 = vmatprep.subr.bf16.mxu1 %v3063_v58  ;;  %v3153_v57 = vld [vmem:[%s4468_s7 + $0x38c] ss:$28 sps:$4 sm:$0xff]   ;;  %v3922_v58 = vld [vmem:[%s4467_s6] sm:$0xf] }
 0x187   :  { %2206 = vmatpush1.bf16.msra.mxu0 %v3058_v59  ;;  %2288 = vmatpush1.bf16.msra.mxu1 %v3061_v60  ;;  %v338_v59 = vsub.s32 3, %v3714_v36  ;;  %v327_v60 = vrot.slane %v3922_v58, %v3717_v37 }
 0x188   :  { %2207 = vmatprep.subr.bf16.mxu0 %v3066_v61  ;;  %2289 = vmatprep.subr.bf16.mxu1 %v3069_v62  ;;  %v331_v61 = vrot.slane %v3922_v58, %v3723_v39 }
 0x189   :  { %v339_v62 = vrot.slane %v3922_v58, %v338_v59 }
 0x18b   :  { %2208 = vmatpush1.bf16.msra.mxu0 %v3064_v63  ;;  %2290 = vmatpush1.bf16.msra.mxu1 %v3067_v0 }
 0x18c   :  { %2209 = vmatprep.subr.bf16.mxu0 %v3072_v1  ;;  %2291 = vmatprep.subr.bf16.mxu1 %v3075_v2 }
 0x18f   :  { %2210 = vmatpush1.bf16.msra.mxu0 %v3070_v3  ;;  %2292 = vmatpush1.bf16.msra.mxu1 %v3073_v4 }
 0x190   :  { %2211 = vmatprep.subr.bf16.mxu0 %v3078_v5  ;;  %2293 = vmatprep.subr.bf16.mxu1 %v3081_v6 }
 0x193   :  { %2212 = vmatpush1.bf16.msra.mxu0 %v3076_v7  ;;  %2294 = vmatpush1.bf16.msra.mxu1 %v3079_v8 }
 0x194   :  { %2213 = vmatprep.subr.bf16.mxu0 %v3084_v9  ;;  %2295 = vmatprep.subr.bf16.mxu1 %v3087_v10 }
 0x197   :  { %2214 = vmatpush1.bf16.msra.mxu0 %v3082_v11  ;;  %2296 = vmatpush1.bf16.msra.mxu1 %v3085_v12 }
 0x198   :  { %2215 = vmatprep.subr.bf16.mxu0 %v3090_v13  ;;  %2297 = vmatprep.subr.bf16.mxu1 %v3093_v14 }
 0x19b   :  { %2216 = vmatpush1.bf16.msra.mxu0 %v3088_v15  ;;  %2298 = vmatpush1.bf16.msra.mxu1 %v3091_v16 }
 0x19c   :  { %2217 = vmatprep.subr.bf16.mxu0 %v3096_v17  ;;  %2299 = vmatprep.subr.bf16.mxu1 %v3099_v19  ;;  %v3148_v17 = vld [vmem:[%s4468_s7 + $0x380] ss:$28 sps:$4 sm:$0xff]   ;;  %v3151_v19 = vld [vmem:[%s4468_s7 + $0x388] ss:$28 sps:$4 sm:$0xff]  }
 0x19f   :  { %2218 = vmatpush1.bf16.msra.mxu0 %v3094_v20  ;;  %2300 = vmatpush1.bf16.msra.mxu1 %v3097_v21  ;;  %v3156_v21 = vld [vmem:[%s4468_s7 + $0x3bc] ss:$28 sps:$4 sm:$0xff]  }
 0x1a0   :  { %2219 = vmatprep.subr.bf16.mxu0 %v3102_v22  ;;  %2301 = vmatprep.subr.bf16.mxu1 %v3105_v23  ;;  %v3159_v22 = vld [vmem:[%s4468_s7 + $0x3c4] ss:$28 sps:$4 sm:$0xff]  }
 0x1a3   :  { %2220 = vmatpush1.bf16.msra.mxu0 %v3100_v24  ;;  %2302 = vmatpush1.bf16.msra.mxu1 %v3103_v25  ;;  %v3154_v24 = vld [vmem:[%s4468_s7 + $0x3b8] ss:$28 sps:$4 sm:$0xff]   ;;  %v3157_v25 = vld [vmem:[%s4468_s7 + $0x3c0] ss:$28 sps:$4 sm:$0xff]  }
 0x1a4   :  { %2221 = vmatprep.subr.bf16.mxu0 %v3108_v26  ;;  %2303 = vmatprep.subr.bf16.mxu1 %v3111_v27  ;;  %v3162_v26 = vld [vmem:[%s4468_s7 + $0x3f4] ss:$28 sps:$4 sm:$0xff]   ;;  %v3165_v27 = vld [vmem:[%s4468_s7 + $0x3fc] ss:$28 sps:$4 sm:$0xff]  }
 0x1a7   :  { %2222 = vmatpush1.bf16.msra.mxu0 %v3106_v28  ;;  %2304 = vmatpush1.bf16.msra.mxu1 %v3109_v29  ;;  %v3160_v28 = vld [vmem:[%s4468_s7 + $0x3f0] ss:$28 sps:$4 sm:$0xff]   ;;  %v3163_v29 = vld [vmem:[%s4468_s7 + $0x3f8] ss:$28 sps:$4 sm:$0xff]  }
 0x1a8   :  { %2223 = vmatprep.subr.bf16.mxu0 %v3114_v30  ;;  %2305 = vmatprep.subr.bf16.mxu1 %v3117_v31  ;;  %v3168_v30 = vld [vmem:[%s4468_s7 + $0x42c] ss:$28 sps:$4 sm:$0xff]   ;;  %v3171_v31 = vld [vmem:[%s4468_s7 + $0x434] ss:$28 sps:$4 sm:$0xff]  }
 0x1ab   :  { %2224 = vmatpush1.bf16.msra.mxu0 %v3112_v32  ;;  %2306 = vmatpush1.bf16.msra.mxu1 %v3115_v33  ;;  %v3166_v32 = vld [vmem:[%s4468_s7 + $0x428] ss:$28 sps:$4 sm:$0xff]   ;;  %v3169_v33 = vld [vmem:[%s4468_s7 + $0x430] ss:$28 sps:$4 sm:$0xff]  }
 0x1ac   :  { %2225 = vmatprep.subr.bf16.mxu0 %v3120_v34  ;;  %2307 = vmatprep.subr.bf16.mxu1 %v3123_v35  ;;  %v3174_v34 = vld [vmem:[%s4468_s7 + $0x464] ss:$28 sps:$4 sm:$0xff]   ;;  %v3177_v35 = vld [vmem:[%s4468_s7 + $0x46c] ss:$28 sps:$4 sm:$0xff]  }
 0x1af   :  { %2226 = vmatpush1.bf16.msra.mxu0 %v3118_v38  ;;  %2308 = vmatpush1.bf16.msra.mxu1 %v3121_v40  ;;  %v3172_v38 = vld [vmem:[%s4468_s7 + $0x460] ss:$28 sps:$4 sm:$0xff]   ;;  %v3175_v40 = vld [vmem:[%s4468_s7 + $0x468] ss:$28 sps:$4 sm:$0xff]  }
 0x1b0   :  { %2227 = vmatprep.subr.bf16.mxu0 %v3126_v41  ;;  %2309 = vmatprep.subr.bf16.mxu1 %v3129_v42  ;;  %v3180_v41 = vld [vmem:[%s4468_s7 + $0x49c] ss:$28 sps:$4 sm:$0xff]   ;;  %v3183_v42 = vld [vmem:[%s4468_s7 + $0x4a4] ss:$28 sps:$4 sm:$0xff]  }
 0x1b3   :  { %2228 = vmatpush1.bf16.msra.mxu0 %v3124_v43  ;;  %2310 = vmatpush1.bf16.msra.mxu1 %v3127_v44  ;;  %v3178_v43 = vld [vmem:[%s4468_s7 + $0x498] ss:$28 sps:$4 sm:$0xff]   ;;  %v3181_v44 = vld [vmem:[%s4468_s7 + $0x4a0] ss:$28 sps:$4 sm:$0xff]  }
 0x1b4   :  { %2229 = vmatprep.subr.bf16.mxu0 %v3132_v45  ;;  %2311 = vmatprep.subr.bf16.mxu1 %v3135_v18  ;;  %v3186_v45 = vld [vmem:[%s4468_s7 + $0x4d4] ss:$28 sps:$4 sm:$0xff]   ;;  %v3189_v18 = vld [vmem:[%s4468_s7 + $0x4dc] ss:$28 sps:$4 sm:$0xff]  }
 0x1b7   :  { %2230 = vmatpush1.bf16.msra.mxu0 %v3130_v46  ;;  %2312 = vmatpush1.bf16.msra.mxu1 %v3133_v47  ;;  %v3184_v46 = vld [vmem:[%s4468_s7 + $0x4d0] ss:$28 sps:$4 sm:$0xff]   ;;  %v3187_v47 = vld [vmem:[%s4468_s7 + $0x4d8] ss:$28 sps:$4 sm:$0xff]  }
 0x1b8   :  { %2231 = vmatprep.subr.bf16.mxu0 %v3138_v48  ;;  %2313 = vmatprep.subr.bf16.mxu1 %v3141_v49  ;;  %v3192_v48 = vld [vmem:[%s4468_s7 + $0x50c] ss:$28 sps:$4 sm:$0xff]   ;;  %v3195_v49 = vld [vmem:[%s4468_s7 + $0x514] ss:$28 sps:$4 sm:$0xff]  }
 0x1bb   :  { %2232 = vmatpush1.bf16.msra.mxu0 %v3136_v50  ;;  %2314 = vmatpush1.bf16.msra.mxu1 %v3139_v51  ;;  %v3190_v50 = vld [vmem:[%s4468_s7 + $0x508] ss:$28 sps:$4 sm:$0xff]   ;;  %v3193_v51 = vld [vmem:[%s4468_s7 + $0x510] ss:$28 sps:$4 sm:$0xff]  }
 0x1bc   :  { %2233 = vmatprep.subr.bf16.mxu0 %v3144_v52  ;;  %2315 = vmatprep.subr.bf16.mxu1 %v3147_v53  ;;  %v3198_v52 = vld [vmem:[%s4468_s7 + $0x544] ss:$28 sps:$4 sm:$0xff]   ;;  %v3201_v53 = vld [vmem:[%s4468_s7 + $0x54c] ss:$28 sps:$4 sm:$0xff]  }
 0x1bf   :  { %2234 = vmatpush1.bf16.msra.mxu0 %v3142_v54  ;;  %2316 = vmatpush1.bf16.msra.mxu1 %v3145_v55  ;;  %v3196_v54 = vld [vmem:[%s4468_s7 + $0x540] ss:$28 sps:$4 sm:$0xff]   ;;  %v3199_v55 = vld [vmem:[%s4468_s7 + $0x548] ss:$28 sps:$4 sm:$0xff]  }
 0x1c0   :  { %2244 = vmatprep.subr.bf16.mxu0 %v3150_v56  ;;  %2326 = vmatprep.subr.bf16.mxu1 %v3153_v57  ;;  %v3204_v56 = vld [vmem:[%s4468_s7 + $0x57c] ss:$28 sps:$4 sm:$0xff]   ;;  %v3207_v57 = vld [vmem:[%s4468_s7 + $0x584] ss:$28 sps:$4 sm:$0xff]  }
 0x255   :  { %v698_v63 = vpop.f32.mrb[0].mxu0  ;;  %v3932_v0 = vpop.f32.mrb[8].mxu1 }
 0x256   :  { %v699_v1 = vadd.f32 %v698_v63, %v327_v60  ;;  %v700_v2 = vpop.f32.mrb[1].mxu0  ;;  %v741_v3 = vpop.f32.mrb[9].mxu1  ;;  %v3202_v60 = vld [vmem:[%s4468_s7 + $0x578] ss:$28 sps:$4 sm:$0xff]  }
 0x257   :  { %v701_v4 = vadd.f32 %v700_v2, %v331_v61  ;;  %v742_v5 = vadd.f32 %v741_v3, %v339_v62  ;;  %v702_v6 = vpop.f32.mrb[2].mxu0  ;;  %v743_v7 = vpop.f32.mrb[10].mxu1  ;;  %v3205_v61 = vld [vmem:[%s4468_s7 + $0x580] ss:$28 sps:$4 sm:$0xff]   ;;  %v3210_v62 = vld [vmem:[%s4468_s7 + $0x5b4] ss:$28 sps:$4 sm:$0xff]  }
 0x258   :  { %v746_v8 = vmul.f32 0.2, %v699_v1  ;;  %v703_v9 = vpop.f32.mrb[3].mxu0  ;;  %v744_v10 = vpop.f32.mrb[11].mxu1  ;;  %v3213_v63 = vld [vmem:[%s4468_s7 + $0x5bc] ss:$28 sps:$4 sm:$0xff]  }
 0x259   :  { %v747_v11 = vmul.f32 0.2, %v701_v4  ;;  %v749_v12 = vmul.f32 0.2, %v742_v5  ;;  %v3211_v2 = vld [vmem:[%s4468_s7 + $0x5b8] ss:$28 sps:$4 sm:$0xff]  }
 0x25a   :  { %v750_v13 = vmax.f32 %v699_v1, %v746_v8  ;;  %v3208_v1 = vld [vmem:[%s4468_s7 + $0x5b0] ss:$28 sps:$4 sm:$0xff]   ;;  %v334_v7 = vsub.s32 2, %v3714_v36  ;;  %v3222_v8 = vld [vmem:[%s4468_s7 + $0x624] ss:$28 sps:$4 sm:$0xff]  }
 0x25b   :  { %v751_v14 = vmax.f32 %v701_v4, %v747_v11  ;;  %v753_v15 = vmax.f32 %v742_v5, %v749_v12  ;;  %v3216_v3 = vld [vmem:[%s4468_s7 + $0x5ec] ss:$28 sps:$4 sm:$0xff]   ;;  %v3219_v4 = vld [vmem:[%s4468_s7 + $0x5f4] ss:$28 sps:$4 sm:$0xff]   ;;  %v3220_v10 = vld [vmem:[%s4468_s7 + $0x620] ss:$28 sps:$4 sm:$0xff]  }
 0x25c   :  { %v3942_v20 = vpack.c.bf16 %v750_v13, %v750_v13  ;;  %v3214_v5 = vld [vmem:[%s4468_s7 + $0x5e8] ss:$28 sps:$4 sm:$0xff]   ;;  %v3217_v6 = vld [vmem:[%s4468_s7 + $0x5f0] ss:$28 sps:$4 sm:$0xff]   ;;  %v335_v12 = vrot.slane %v3922_v58, %v334_v7  ;;  %v3228_v13 = vld [vmem:[%s4468_s7 + $0x65c] ss:$28 sps:$4 sm:$0xff]  }
 0x25d   :  { %v3934_v16 = vpack.c.bf16 %v751_v14, %v751_v14  ;;  %v3952_v23 = vpack.c.bf16 %v753_v15, %v753_v15  ;;  %v3225_v9 = vld [vmem:[%s4468_s7 + $0x62c] ss:$28 sps:$4 sm:$0xff]   ;;  %v3231_v14 = vld [vmem:[%s4468_s7 + $0x664] ss:$28 sps:$4 sm:$0xff]   ;;  %v3226_v15 = vld [vmem:[%s4468_s7 + $0x658] ss:$28 sps:$4 sm:$0xff]  }
 0x25e   :  { %v3223_v11 = vld [vmem:[%s4468_s7 + $0x628] ss:$28 sps:$4 sm:$0xff]   ;;  %v3229_v58 = vld [vmem:[%s4468_s7 + $0x660] ss:$28 sps:$4 sm:$0xff]  }
 0x25f   :  { %2235 = vmatprep.mubr.bf16.mxu0 %v3934_v16  ;;  %2317 = vmatprep.mubr.bf16.mxu1 %v3934_v16 }
 0x260   :  { %2236 = vmatmul.mubr.bf16.vlgmr.msra.gmra.mrb[4].mxu0 %v3942_v20  ;;  %2318 = vmatmul.mubr.bf16.vlgmr.msra.gmra.mrb[12].mxu1 %v3942_v20 }
 0x261   :  { %2245 = vmatpush1.bf16.msra.mxu0 %v3148_v17  ;;  %2327 = vmatpush1.bf16.msra.mxu1 %v3151_v19  ;;  %v740_v17 = vadd.f32 %v3932_v0, %v335_v12  ;;  %v3234_v19 = vld [vmem:[%s4468_s7 + $0x694] ss:$28 sps:$4 sm:$0xff]   ;;  %v3296_v12 = vld [vmem:[%s4468_s7 + $0x244] ss:$28 sps:$4 sm:$0xff]  }
 0x262   :  { %2276 = vmatprep.mubr.bf16.mxu0 %v3952_v23  ;;  %2358 = vmatprep.mubr.bf16.mxu1 %v3952_v23  ;;  %v3235_v0 = vld [vmem:[%s4468_s7 + $0x698] ss:$28 sps:$4 sm:$0xff]  }
 0x263   :  { %2246 = vmatprep.subr.bf16.mxu0 %v3156_v21  ;;  %2328 = vmatprep.subr.bf16.mxu1 %v3159_v22  ;;  %v3237_v21 = vld [vmem:[%s4468_s7 + $0x69c] ss:$28 sps:$4 sm:$0xff]   ;;  %v3232_v22 = vld [vmem:[%s4468_s7 + $0x690] ss:$28 sps:$4 sm:$0xff]  }
 0x265   :  { %2247 = vmatpush1.bf16.msra.mxu0 %v3154_v24  ;;  %2329 = vmatpush1.bf16.msra.mxu1 %v3157_v25  ;;  %v748_v24 = vmul.f32 0.2, %v740_v17  ;;  %v3240_v25 = vld [vmem:[%s4468_s7 + $0x6cc] ss:$28 sps:$4 sm:$0xff]  }
 0x266   :  { %2248 = vmatprep.subr.bf16.mxu0 %v3162_v26  ;;  %2330 = vmatprep.subr.bf16.mxu1 %v3165_v27  ;;  %v3243_v26 = vld [vmem:[%s4468_s7 + $0x6d4] ss:$28 sps:$4 sm:$0xff]   ;;  %v3238_v27 = vld [vmem:[%s4468_s7 + $0x6c8] ss:$28 sps:$4 sm:$0xff]  }
 0x269   :  { %2249 = vmatpush1.bf16.msra.mxu0 %v3160_v28  ;;  %2331 = vmatpush1.bf16.msra.mxu1 %v3163_v29  ;;  %v3241_v28 = vld [vmem:[%s4468_s7 + $0x6d0] ss:$28 sps:$4 sm:$0xff]   ;;  %v752_v29 = vmax.f32 %v740_v17, %v748_v24  ;;  %v3302_v17 = vld [vmem:[%s4468_s7 + $0x600] ss:$28 sps:$4 sm:$0xff]  }
 0x26a   :  { %2250 = vmatprep.subr.bf16.mxu0 %v3168_v30  ;;  %2332 = vmatprep.subr.bf16.mxu1 %v3171_v31  ;;  %v3246_v30 = vld [vmem:[%s4468_s7 + $0x14] ss:$28 sps:$4 sm:$0xff]  }
 0x26b   :  { %v3247_v31 = vld [vmem:[%s4468_s7 + $0x1d8] ss:$28 sps:$4 sm:$0xff]   ;;  %v3304_v24 = vld [vmem:[%s4468_s7 + $0x2b0] ss:$28 sps:$4 sm:$0xff]  }
 0x26d   :  { %2251 = vmatpush1.bf16.msra.mxu0 %v3166_v32  ;;  %2333 = vmatpush1.bf16.msra.mxu1 %v3169_v33  ;;  %v3244_v32 = vld [vmem:[%s4468_s7 + $0x10] ss:$28 sps:$4 sm:$0xff]   ;;  %v4146_v33 = vpack.c.bf16 %v752_v29, %v752_v29 }
 0x26e   :  { %2252 = vmatprep.subr.bf16.mxu0 %v3174_v34  ;;  %2334 = vmatprep.subr.bf16.mxu1 %v3177_v35  ;;  %v3248_v34 = vld [vmem:[%s4468_s7 + $0x18] ss:$28 sps:$4 sm:$0xff]   ;;  %v3251_v35 = vld [vmem:[%s4468_s7 + $0x4c] ss:$28 sps:$4 sm:$0xff]  }
 0x26f   :  { %v3313_v29 = vld [vmem:[%s4468_s7 + $0x4b0] ss:$28 sps:$4 sm:$0xff]  }
 0x271   :  { %2253 = vmatpush1.bf16.msra.mxu0 %v3172_v38  ;;  %2335 = vmatpush1.bf16.msra.mxu1 %v3175_v40  ;;  %v3252_v38 = vld [vmem:[%s4468_s7 + $0x210] ss:$28 sps:$4 sm:$0xff]   ;;  %v3249_v40 = vld [vmem:[%s4468_s7 + $0x48] ss:$28 sps:$4 sm:$0xff]  }
 0x272   :  { %2254 = vmatprep.subr.bf16.mxu0 %v3180_v41  ;;  %2336 = vmatprep.subr.bf16.mxu1 %v3183_v42  ;;  %v3253_v41 = vld [vmem:[%s4468_s7 + $0x50] ss:$28 sps:$4 sm:$0xff]   ;;  %v3256_v42 = vld [vmem:[%s4468_s7 + $0x84] ss:$28 sps:$4 sm:$0xff]  }
 0x275   :  { %2255 = vmatpush1.bf16.msra.mxu0 %v3178_v43  ;;  %2337 = vmatpush1.bf16.msra.mxu1 %v3181_v44  ;;  %v3257_v43 = vld [vmem:[%s4468_s7 + $0x248] ss:$28 sps:$4 sm:$0xff]   ;;  %v3254_v44 = vld [vmem:[%s4468_s7 + $0x80] ss:$28 sps:$4 sm:$0xff]  }
 0x276   :  { %2256 = vmatprep.subr.bf16.mxu0 %v3186_v45  ;;  %2338 = vmatprep.subr.bf16.mxu1 %v3189_v18  ;;  %v3261_v45 = vld [vmem:[%s4468_s7 + $0xbc] ss:$28 sps:$4 sm:$0xff]  }
 0x277   :  { %v3262_v18 = vld [vmem:[%s4468_s7 + $0x280] ss:$28 sps:$4 sm:$0xff]  }
 0x279   :  { %2257 = vmatpush1.bf16.msra.mxu0 %v3184_v46  ;;  %2339 = vmatpush1.bf16.msra.mxu1 %v3187_v47  ;;  %v3259_v46 = vld [vmem:[%s4468_s7 + $0xb8] ss:$28 sps:$4 sm:$0xff]   ;;  %v3263_v47 = vld [vmem:[%s4468_s7 + $0xc0] ss:$28 sps:$4 sm:$0xff]  }
 0x27a   :  { %2258 = vmatprep.subr.bf16.mxu0 %v3192_v48  ;;  %2340 = vmatprep.subr.bf16.mxu1 %v3195_v49  ;;  %v3266_v48 = vld [vmem:[%s4468_s7 + $0xf4] ss:$28 sps:$4 sm:$0xff]  }
 0x27b   :  { %v3267_v49 = vld [vmem:[%s4468_s7 + $0x2b8] ss:$28 sps:$4 sm:$0xff]  }
 0x27d   :  { %2259 = vmatpush1.bf16.msra.mxu0 %v3190_v50  ;;  %2341 = vmatpush1.bf16.msra.mxu1 %v3193_v51  ;;  %v3264_v50 = vld [vmem:[%s4468_s7 + $0xf0] ss:$28 sps:$4 sm:$0xff]   ;;  %v3268_v51 = vld [vmem:[%s4468_s7 + $0xf8] ss:$28 sps:$4 sm:$0xff]  }
 0x27e   :  { %2260 = vmatprep.subr.bf16.mxu0 %v3198_v52  ;;  %2342 = vmatprep.subr.bf16.mxu1 %v3201_v53  ;;  %v3271_v52 = vld [vmem:[%s4468_s7 + $0x12c] ss:$28 sps:$4 sm:$0xff]  }
 0x27f   :  { %v3272_v53 = vld [vmem:[%s4468_s7 + $0x2f0] ss:$28 sps:$4 sm:$0xff]  }
 0x281   :  { %2261 = vmatpush1.bf16.msra.mxu0 %v3196_v54  ;;  %2343 = vmatpush1.bf16.msra.mxu1 %v3199_v55  ;;  %v3269_v54 = vld [vmem:[%s4468_s7 + $0x128] ss:$28 sps:$4 sm:$0xff]   ;;  %v3273_v55 = vld [vmem:[%s4468_s7 + $0x130] ss:$28 sps:$4 sm:$0xff]  }
 0x282   :  { %2262 = vmatprep.subr.bf16.mxu0 %v3204_v56  ;;  %2344 = vmatprep.subr.bf16.mxu1 %v3207_v57  ;;  %v3276_v56 = vld [vmem:[%s4468_s7 + $0x164] ss:$28 sps:$4 sm:$0xff]  }
 0x283   :  { %v3277_v57 = vld [vmem:[%s4468_s7 + $0x328] ss:$28 sps:$4 sm:$0xff]  }
 0x285   :  { %2263 = vmatpush1.bf16.msra.mxu0 %v3202_v60  ;;  %2345 = vmatpush1.bf16.msra.mxu1 %v3205_v61  ;;  %v3274_v60 = vld [vmem:[%s4468_s7 + $0x160] ss:$28 sps:$4 sm:$0xff]   ;;  %v3278_v61 = vld [vmem:[%s4468_s7 + $0x168] ss:$28 sps:$4 sm:$0xff]  }
 0x286   :  { %2264 = vmatprep.subr.bf16.mxu0 %v3210_v62  ;;  %2346 = vmatprep.subr.bf16.mxu1 %v3213_v63  ;;  %v3281_v62 = vld [vmem:[%s4468_s7 + $0x19c] ss:$28 sps:$4 sm:$0xff]  }
 0x287   :  { %v3282_v63 = vld [vmem:[%s4468_s7 + $0x360] ss:$28 sps:$4 sm:$0xff]  }
 0x289   :  { %2265 = vmatpush1.bf16.msra.mxu0 %v3208_v1  ;;  %2347 = vmatpush1.bf16.msra.mxu1 %v3211_v2  ;;  %v3279_v1 = vld [vmem:[%s4468_s7 + $0x198] ss:$28 sps:$4 sm:$0xff]   ;;  %v3283_v2 = vld [vmem:[%s4468_s7 + $0x1a0] ss:$28 sps:$4 sm:$0xff]  }
 0x28a   :  { %2266 = vmatprep.subr.bf16.mxu0 %v3216_v3  ;;  %2348 = vmatprep.subr.bf16.mxu1 %v3219_v4  ;;  %v3286_v3 = vld [vmem:[%s4468_s7 + $0x1d4] ss:$28 sps:$4 sm:$0xff]  }
 0x28b   :  { %v3287_v4 = vld [vmem:[%s4468_s7 + $0x558] ss:$28 sps:$4 sm:$0xff]  }
 0x28d   :  { %2267 = vmatpush1.bf16.msra.mxu0 %v3214_v5  ;;  %2349 = vmatpush1.bf16.msra.mxu1 %v3217_v6  ;;  %v3284_v5 = vld [vmem:[%s4468_s7 + $0x1d0] ss:$28 sps:$4 sm:$0xff]   ;;  %v3288_v6 = vld [vmem:[%s4468_s7 + $0x398] ss:$28 sps:$4 sm:$0xff]  }
 0x28e   :  { %2268 = vmatprep.subr.bf16.mxu0 %v3222_v8  ;;  %2350 = vmatprep.subr.bf16.mxu1 %v3225_v9  ;;  %v3291_v8 = vld [vmem:[%s4468_s7 + $0x20c] ss:$28 sps:$4 sm:$0xff]  }
 0x28f   :  { %v3292_v9 = vld [vmem:[%s4468_s7 + $0x590] ss:$28 sps:$4 sm:$0xff]  }
 0x291   :  { %2269 = vmatpush1.bf16.msra.mxu0 %v3220_v10  ;;  %2351 = vmatpush1.bf16.msra.mxu1 %v3223_v11  ;;  %v3289_v10 = vld [vmem:[%s4468_s7 + $0x208] ss:$28 sps:$4 sm:$0xff]   ;;  %v3293_v11 = vld [vmem:[%s4468_s7 + $0x3d0] ss:$28 sps:$4 sm:$0xff]  }
 0x292   :  { %2270 = vmatprep.subr.bf16.mxu0 %v3228_v13  ;;  %2352 = vmatprep.subr.bf16.mxu1 %v3231_v14  ;;  %v3297_v13 = vld [vmem:[%s4468_s7 + $0x5c8] ss:$28 sps:$4 sm:$0xff]   ;;  %v3294_v14 = vld [vmem:[%s4468_s7 + $0x240] ss:$28 sps:$4 sm:$0xff]  }
 0x295   :  { %2271 = vmatpush1.bf16.msra.mxu0 %v3226_v15  ;;  %2353 = vmatpush1.bf16.msra.mxu1 %v3229_v58  ;;  %v3298_v15 = vld [vmem:[%s4468_s7 + $0x408] ss:$28 sps:$4 sm:$0xff]   ;;  %v3301_v58 = vld [vmem:[%s4468_s7 + $0x27c] ss:$28 sps:$4 sm:$0xff]  }
 0x296   :  { %2272 = vmatprep.subr.bf16.mxu0 %v3234_v19  ;;  %2354 = vmatprep.subr.bf16.mxu1 %v3237_v21  ;;  %v3299_v19 = vld [vmem:[%s4468_s7 + $0x278] ss:$28 sps:$4 sm:$0xff]   ;;  %v3303_v21 = vld [vmem:[%s4468_s7 + $0x440] ss:$28 sps:$4 sm:$0xff]  }
 0x299   :  { %2273 = vmatpush1.bf16.msra.mxu0 %v3232_v22  ;;  %2355 = vmatpush1.bf16.msra.mxu1 %v3235_v0  ;;  %v3306_v22 = vld [vmem:[%s4468_s7 + $0x2b4] ss:$28 sps:$4 sm:$0xff]  }
 0x29a   :  { %2274 = vmatprep.subr.bf16.mxu0 %v3240_v25  ;;  %2356 = vmatprep.subr.bf16.mxu1 %v3243_v26  ;;  %v3307_v0 = vld [vmem:[%s4468_s7 + $0x638] ss:$28 sps:$4 sm:$0xff]   ;;  %v3311_v26 = vld [vmem:[%s4468_s7 + $0x2ec] ss:$28 sps:$4 sm:$0xff]  }
 0x29b   :  { %v3308_v25 = vld [vmem:[%s4468_s7 + $0x478] ss:$28 sps:$4 sm:$0xff]  }
 0x29d   :  { %2275 = vmatpush1.bf16.msra.mxu0 %v3238_v27  ;;  %2357 = vmatpush1.bf16.msra.mxu1 %v3241_v28  ;;  %v3312_v27 = vld [vmem:[%s4468_s7 + $0x670] ss:$28 sps:$4 sm:$0xff]   ;;  %v3309_v28 = vld [vmem:[%s4468_s7 + $0x2e8] ss:$28 sps:$4 sm:$0xff]  }
 0x29e   :  { %2367 = vmatprep.subr.bf16.mxu0 %v3246_v30  ;;  %2867 = vmatprep.subr.bf16.mxu1 %v3247_v31  ;;  %v3316_v30 = vld [vmem:[%s4468_s7 + $0x324] ss:$28 sps:$4 sm:$0xff]  }
 0x29f   :  { %v3317_v31 = vld [vmem:[%s4468_s7 + $0x6a8] ss:$28 sps:$4 sm:$0xff]  }
 0x2a0   :  { %2277 = vmatmul.mubr.bf16.vlgmr.msra.gmra.mrb[4].mxu0 %v4146_v33  ;;  %2359 = vmatmul.mubr.bf16.vlgmr.msra.gmra.mrb[12].mxu1 %v4146_v33 }
 0x2a1   :  { %2368 = vmatpush1.bf16.msra.mxu0 %v3244_v32  ;;  %2399 = vmatprep.mubr.bf16.mxu0 %v3934_v16  ;;  %v3314_v32 = vld [vmem:[%s4468_s7 + $0x320] ss:$28 sps:$4 sm:$0xff]  }
 0x2a2   :  { %2868 = vmatpush3.bf16.msra.mxu1 %v3248_v34  ;;  %2481 = vmatprep.mubr.bf16.mxu1 %v3934_v16  ;;  %v3258_v16 = vld [vmem:[%s4468_s7 + $0x88] ss:$28 sps:$4 sm:$0xff]  }
 0x2a3   :  { %2369 = vmatprep.subr.bf16.mxu0 %v3251_v35  ;;  %2869 = vmatprep.subr.bf16.mxu1 %v3252_v38  ;;  %v3318_v34 = vld [vmem:[%s4468_s7 + $0x4e8] ss:$28 sps:$4 sm:$0xff]   ;;  %v3321_v35 = vld [vmem:[%s4468_s7 + $0x35c] ss:$28 sps:$4 sm:$0xff]  }
 0x2a4   :  { %v3322_v38 = vld [vmem:[%s4468_s7 + $0x6e0] ss:$28 sps:$4 sm:$0xff]  }
 0x2a5   :  { %2370 = vmatpush1.bf16.msra.mxu0 %v3249_v40  ;;  %v3319_v40 = vld [vmem:[%s4468_s7 + $0x358] ss:$28 sps:$4 sm:$0xff]  }
 0x2a6   :  { %2870 = vmatpush3.bf16.msra.mxu1 %v3253_v41  ;;  %2371 = vmatprep.subr.bf16.mxu0 %v3256_v42  ;;  %v3323_v41 = vld [vmem:[%s4468_s7 + $0x520] ss:$28 sps:$4 sm:$0xff]   ;;  %v3326_v42 = vld [vmem:[%s4468_s7 + $0x394] ss:$28 sps:$4 sm:$0xff]  }
 0x2a7   :  { %2871 = vmatprep.subr.bf16.mxu1 %v3257_v43  ;;  %v3324_v43 = vld [vmem:[%s4468_s7 + $0x390] ss:$28 sps:$4 sm:$0xff]  }
 0x2a9   :  { %2372 = vmatpush1.bf16.msra.mxu0 %v3254_v44  ;;  %v3329_v44 = vld [vmem:[%s4468_s7 + $0x3cc] ss:$28 sps:$4 sm:$0xff]  }
 0x2aa   :  { %2872 = vmatpush3.bf16.msra.mxu1 %v3258_v16  ;;  %2373 = vmatprep.subr.bf16.mxu0 %v3261_v45  ;;  %v3327_v16 = vld [vmem:[%s4468_s7 + $0x3c8] ss:$28 sps:$4 sm:$0xff]  }
 0x2ab   :  { %2873 = vmatprep.subr.bf16.mxu1 %v3262_v18  ;;  %v3332_v45 = vld [vmem:[%s4468_s7 + $0x404] ss:$28 sps:$4 sm:$0xff]  }
 0x2ac   :  { %v3330_v18 = vld [vmem:[%s4468_s7 + $0x400] ss:$28 sps:$4 sm:$0xff]  }
 0x2ad   :  { %2374 = vmatpush1.bf16.msra.mxu0 %v3259_v46  ;;  %v3338_v46 = vld [vmem:[%s4468_s7 + $0x474] ss:$28 sps:$4 sm:$0xff]  }
 0x2ae   :  { %2874 = vmatpush3.bf16.msra.mxu1 %v3263_v47  ;;  %2375 = vmatprep.subr.bf16.mxu0 %v3266_v48  ;;  %v3336_v47 = vld [vmem:[%s4468_s7 + $0x470] ss:$28 sps:$4 sm:$0xff]  }
 0x2af   :  { %2875 = vmatprep.subr.bf16.mxu1 %v3267_v49  ;;  %v3341_v48 = vld [vmem:[%s4468_s7 + $0x4ac] ss:$28 sps:$4 sm:$0xff]  }
 0x2b0   :  { %v3339_v49 = vld [vmem:[%s4468_s7 + $0x4a8] ss:$28 sps:$4 sm:$0xff]  }
 0x2b1   :  { %2376 = vmatpush1.bf16.msra.mxu0 %v3264_v50  ;;  %v3344_v50 = vld [vmem:[%s4468_s7 + $0x4e4] ss:$28 sps:$4 sm:$0xff]  }
 0x2b2   :  { %2876 = vmatpush3.bf16.msra.mxu1 %v3268_v51  ;;  %2377 = vmatprep.subr.bf16.mxu0 %v3271_v52  ;;  %v3342_v51 = vld [vmem:[%s4468_s7 + $0x4e0] ss:$28 sps:$4 sm:$0xff]  }
 0x2b3   :  { %2877 = vmatprep.subr.bf16.mxu1 %v3272_v53  ;;  %v3347_v52 = vld [vmem:[%s4468_s7 + $0x51c] ss:$28 sps:$4 sm:$0xff]  }
 0x2b4   :  { %v3345_v53 = vld [vmem:[%s4468_s7 + $0x518] ss:$28 sps:$4 sm:$0xff]  }
 0x2b5   :  { %2378 = vmatpush1.bf16.msra.mxu0 %v3269_v54  ;;  %v3350_v54 = vld [vmem:[%s4468_s7 + $0x554] ss:$28 sps:$4 sm:$0xff]  }
 0x2b6   :  { %2878 = vmatpush3.bf16.msra.mxu1 %v3273_v55  ;;  %2379 = vmatprep.subr.bf16.mxu0 %v3276_v56  ;;  %v3348_v55 = vld [vmem:[%s4468_s7 + $0x550] ss:$28 sps:$4 sm:$0xff]  }
 0x2b7   :  { %2879 = vmatprep.subr.bf16.mxu1 %v3277_v57  ;;  %v3353_v56 = vld [vmem:[%s4468_s7 + $0x58c] ss:$28 sps:$4 sm:$0xff]  }
 0x2b8   :  { %v3351_v57 = vld [vmem:[%s4468_s7 + $0x588] ss:$28 sps:$4 sm:$0xff]  }
 0x2b9   :  { %2380 = vmatpush1.bf16.msra.mxu0 %v3274_v60  ;;  %v3356_v60 = vld [vmem:[%s4468_s7 + $0x5c4] ss:$28 sps:$4 sm:$0xff]  }
 0x2ba   :  { %2880 = vmatpush3.bf16.msra.mxu1 %v3278_v61  ;;  %2381 = vmatprep.subr.bf16.mxu0 %v3281_v62  ;;  %v3354_v61 = vld [vmem:[%s4468_s7 + $0x5c0] ss:$28 sps:$4 sm:$0xff]  }
 0x2bb   :  { %2881 = vmatprep.subr.bf16.mxu1 %v3282_v63  ;;  %v3359_v62 = vld [vmem:[%s4468_s7 + $0x5fc] ss:$28 sps:$4 sm:$0xff]  }
 0x2bc   :  { %v3357_v63 = vld [vmem:[%s4468_s7 + $0x5f8] ss:$28 sps:$4 sm:$0xff]  }
 0x2bd   :  { %2382 = vmatpush1.bf16.msra.mxu0 %v3279_v1  ;;  %v3362_v1 = vld [vmem:[%s4468_s7 + $0x634] ss:$28 sps:$4 sm:$0xff]  }
 0x2be   :  { %2882 = vmatpush3.bf16.msra.mxu1 %v3283_v2  ;;  %2383 = vmatprep.subr.bf16.mxu0 %v3286_v3  ;;  %v3360_v2 = vld [vmem:[%s4468_s7 + $0x630] ss:$28 sps:$4 sm:$0xff]  }
 0x2bf   :  { %2889 = vmatprep.subr.bf16.mxu1 %v3287_v4  ;;  %v3365_v3 = vld [vmem:[%s4468_s7 + $0x66c] ss:$28 sps:$4 sm:$0xff]  }
 0x2c0   :  { %v3363_v4 = vld [vmem:[%s4468_s7 + $0x668] ss:$28 sps:$4 sm:$0xff]  }
 0x2c1   :  { %2482 = vmatmul.mubr.bf16.vlgmr.msra.gmra.mrb[16].mxu1 %v3942_v20  ;;  %2384 = vmatpush1.bf16.msra.mxu0 %v3284_v5  ;;  %v3368_v5 = vld [vmem:[%s4468_s7 + $0x6a4] ss:$28 sps:$4 sm:$0xff]  }
 0x2c2   :  { %2890 = vmatpush3.bf16.msra.mxu1 %v3288_v6  ;;  %2521 = vmatprep.mubr.bf16.mxu1 %v3952_v23  ;;  %v3366_v6 = vld [vmem:[%s4468_s7 + $0x6a0] ss:$28 sps:$4 sm:$0xff]  }
 0x2c3   :  { %2385 = vmatprep.subr.bf16.mxu0 %v3291_v8  ;;  %2891 = vmatprep.subr.bf16.mxu1 %v3292_v9  ;;  %v3371_v8 = vld [vmem:[%s4468_s7 + $0x6dc] ss:$28 sps:$4 sm:$0xff]  }
 0x2c4   :  { %v3369_v9 = vld [vmem:[%s4468_s7 + $0x6d8] ss:$28 sps:$4 sm:$0xff]  }
 0x2c5   :  { %2386 = vmatpush1.bf16.msra.mxu0 %v3289_v10  ;;  %v1014_v10 = vld [vmem:[%s4469_s8] sm:$0x7f] }
 0x2c6   :  { %2892 = vmatpush3.bf16.msra.mxu1 %v3293_v11  ;;  %2387 = vmatprep.subr.bf16.mxu0 %v3296_v12  ;;  %v1019_v11 = vrot.slane %v1014_v10, %v3717_v37  ;;  %v1027_v12 = vrot.slane %v1014_v10, %v334_v7 }
 0x2c7   :  { %2893 = vmatprep.subr.bf16.mxu1 %v3297_v13  ;;  %v1023_v13 = vrot.slane %v1014_v10, %v3723_v39 }
 0x2c9   :  { %2388 = vmatpush1.bf16.msra.mxu0 %v3294_v14  ;;  %v1031_v14 = vrot.slane %v1014_v10, %v338_v59 }
 0x2ca   :  { %2894 = vmatpush3.bf16.msra.mxu1 %v3298_v15  ;;  %2389 = vmatprep.subr.bf16.mxu0 %v3301_v58 }
 0x2cb   :  { %2895 = vmatprep.subr.bf16.mxu1 %v3302_v17 }
 0x2cd   :  { %2390 = vmatpush1.bf16.msra.mxu0 %v3299_v19 }
 0x2ce   :  { %2896 = vmatpush3.bf16.msra.mxu1 %v3303_v21  ;;  %2391 = vmatprep.subr.bf16.mxu0 %v3306_v22 }
 0x2cf   :  { %2897 = vmatprep.subr.bf16.mxu1 %v3307_v0 }
 0x2d1   :  { %2392 = vmatpush1.bf16.msra.mxu0 %v3304_v24 }
 0x2d2   :  { %2898 = vmatpush3.bf16.msra.mxu1 %v3308_v25  ;;  %2393 = vmatprep.subr.bf16.mxu0 %v3311_v26 }
 0x2d3   :  { %2899 = vmatprep.subr.bf16.mxu1 %v3312_v27 }
 0x2d5   :  { %2394 = vmatpush1.bf16.msra.mxu0 %v3309_v28 }
 0x2d6   :  { %2900 = vmatpush3.bf16.msra.mxu1 %v3313_v29  ;;  %2395 = vmatprep.subr.bf16.mxu0 %v3316_v30 }
 0x2d7   :  { %2901 = vmatprep.subr.bf16.mxu1 %v3317_v31 }
 0x2d9   :  { %2396 = vmatpush1.bf16.msra.mxu0 %v3314_v32 }
 0x2da   :  { %2902 = vmatpush3.bf16.msra.mxu1 %v3318_v34  ;;  %2397 = vmatprep.subr.bf16.mxu0 %v3321_v35  ;;  %v1042_v34 = vsub.s32 6, %v3714_v36 }
 0x2db   :  { %2903 = vmatprep.subr.bf16.mxu1 %v3322_v38 }
 0x2dc   :  { %v1043_v35 = vrot.slane %v1014_v10, %v1042_v34 }
 0x2dd   :  { %2398 = vmatpush1.bf16.msra.mxu0 %v3319_v40 }
 0x2de   :  { %2904 = vmatpush3.bf16.msra.mxu1 %v3323_v41  ;;  %2408 = vmatprep.subr.bf16.mxu0 %v3326_v42 }
 0x2e0   :  { %2400 = vmatmul.mubr.bf16.vlgmr.msra.gmra.mrb[8].mxu0 %v3942_v20  ;;  %v3335_v20 = vld [vmem:[%s4468_s7 + $0x43c] ss:$28 sps:$4 sm:$0xff]  }
 0x2e1   :  { %2522 = vmatmul.mubr.bf16.vlgmr.msra.gmra.mrb[20].mxu1 %v4146_v33  ;;  %2409 = vmatpush1.bf16.msra.mxu0 %v3324_v43 }
 0x2e2   :  { %2440 = vmatprep.mubr.bf16.mxu0 %v3952_v23  ;;  %2410 = vmatprep.subr.bf16.mxu0 %v3329_v44  ;;  %v3333_v23 = vld [vmem:[%s4468_s7 + $0x438] ss:$28 sps:$4 sm:$0xff]   ;;  %s3412_s7 = smov [#allocation2]  }
 0x2e3   :  { %s2550_s8 = sshll.u32 %s3412_s7, 4  ;;  %s2551_s8 = int_to_ptr.vmem [resolvable:$true] %s2550_s8 }
 0x2e4   :  { %s3386_s29 = scalar_lea.vmem %s2551_s8, 896  ;;  %p3391_p1 = scmp.lt.s32.totalorder %s2551_s8, %s2551_s8 }
 0x2e5   :  { %2411 = vmatpush1.bf16.msra.mxu0 %v3327_v16  ;;  %p3387_p0 = scmp.ne.s32.totalorder %s2551_s8, %s3386_s29  ;;  %p3392_p2 = scmp.lt.s32.totalorder %s3386_s29, %s3386_s29 }
 0x2e6   :  { %2412 = vmatprep.subr.bf16.mxu0 %v3332_v45 }
 0x2e7   :  { %p3393_p3 = por %p3392_p2, %p3391_p1 }
 0x2e9   :  { %2413 = vmatpush1.bf16.msra.mxu0 %v3330_v18  ;;  %v1034_v18 = vsub.s32 4, %v3714_v36  ;;  %p3394_p4 = pnand %p3393_p3, %p3387_p0 }
 0x2ea   :  { %2414 = vmatprep.subr.bf16.mxu0 %v3335_v20  ;;  %v1038_v20 = vsub.s32 5, %v3714_v36 }
 0x2ed   :  { %2415 = vmatpush1.bf16.msra.mxu0 %v3333_v23  ;;  %v1035_v23 = vrot.slane %v1014_v10, %v1034_v18 }
 0x2ee   :  { %2416 = vmatprep.subr.bf16.mxu0 %v3338_v46  ;;  %v1039_v46 = vrot.slane %v1014_v10, %v1038_v20 }
 0x2f1   :  { %2417 = vmatpush1.bf16.msra.mxu0 %v3336_v47 }
 0x2f2   :  { %2418 = vmatprep.subr.bf16.mxu0 %v3341_v48 }
 0x2f5   :  { %2419 = vmatpush1.bf16.msra.mxu0 %v3339_v49 }
 0x2f6   :  { %2420 = vmatprep.subr.bf16.mxu0 %v3344_v50 }
 0x2f9   :  { %2421 = vmatpush1.bf16.msra.mxu0 %v3342_v51 }
 0x2fa   :  { %2422 = vmatprep.subr.bf16.mxu0 %v3347_v52 }
 0x2fd   :  { %2423 = vmatpush1.bf16.msra.mxu0 %v3345_v53 }
 0x2fe   :  { %2424 = vmatprep.subr.bf16.mxu0 %v3350_v54 }
 0x301   :  { %2425 = vmatpush1.bf16.msra.mxu0 %v3348_v55 }
 0x302   :  { %2426 = vmatprep.subr.bf16.mxu0 %v3353_v56 }
 0x305   :  { %2427 = vmatpush1.bf16.msra.mxu0 %v3351_v57 }
 0x306   :  { %2428 = vmatprep.subr.bf16.mxu0 %v3356_v60 }
 0x309   :  { %2429 = vmatpush1.bf16.msra.mxu0 %v3354_v61 }
 0x30a   :  { %2430 = vmatprep.subr.bf16.mxu0 %v3359_v62 }
 0x30d   :  { %2431 = vmatpush1.bf16.msra.mxu0 %v3357_v63 }
 0x30e   :  { %2432 = vmatprep.subr.bf16.mxu0 %v3362_v1 }
 0x311   :  { %2433 = vmatpush1.bf16.msra.mxu0 %v3360_v2 }
 0x312   :  { %2434 = vmatprep.subr.bf16.mxu0 %v3365_v3 }
 0x315   :  { %2435 = vmatpush1.bf16.msra.mxu0 %v3363_v4 }
 0x316   :  { %2436 = vmatprep.subr.bf16.mxu0 %v3368_v5 }
 0x319   :  { %2437 = vmatpush1.bf16.msra.mxu0 %v3366_v6 }
 0x31a   :  { %2438 = vmatprep.subr.bf16.mxu0 %v3371_v8 }
 0x31d   :  { %2439 = vmatpush1.bf16.msra.mxu0 %v3369_v9 }
 0x320   :  { %2441 = vmatmul.mubr.bf16.vlgmr.msra.gmra.mrb[8].mxu0 %v4146_v33 }
 0x373   :  { %v2278_v15 = vpop.f32.mrb[4].mxu0  ;;  %v2360_v58 = vpop.f32.mrb[12].mxu1 }
 0x374   :  { %v2911_v17 = vadd.f32 %v2278_v15, %v1019_v11  ;;  %v2913_v19 = vadd.f32 %v2360_v58, %v1027_v12  ;;  %v2280_v21 = vpop.f32.mrb[5].mxu0  ;;  %v2362_v33 = vpop.f32.mrb[13].mxu1 }
 0x375   :  { %v2912_v22 = vadd.f32 %v2280_v21, %v1023_v13  ;;  %v2914_v0 = vadd.f32 %v2362_v33, %v1031_v14  ;;  %v2282_v24 = vpop.f32.mrb[6].mxu0  ;;  %v2364_v25 = vpop.f32.mrb[14].mxu1 }
 0x376   :  { %3372 = vtanh.f32 %v2911_v17  ;;  %v2283_v37 = vpop.f32.mrb[7].mxu0  ;;  %v2365_v26 = vpop.f32.mrb[15].mxu1 }
 0x377   :  { %3374 = vtanh.f32 %v2913_v19 }
 0x378   :  { %3376 = vtanh.f32 %v2912_v22 }
 0x379   :  { %3378 = vtanh.f32 %v2914_v0 }
 0x380   :  { %v3373_v39 = vpop.eup %3372 }
 0x381   :  { %v3375_v7 = vpop.eup %3374  ;;  %2536 = vst [vmem:[#allocation2] sm:$0xff] %v3373_v39 }
 0x382   :  { %v3377_v59 = vpop.eup %3376  ;;  %2538 = vst [vmem:[#allocation2 + $0x10] sm:$0xff] %v3375_v7 }
 0x383   :  { %v3379_v27 = vpop.eup %3378  ;;  %2537 = vst [vmem:[#allocation2 + $0x8] sm:$0xff] %v3377_v59 }
 0x384   :  { %2539 = vst [vmem:[#allocation2 + $0x18] sm:$0xff] %v3379_v27 }
 0x394   :  { %v2883_v28 = vpop.f32.mrb[16].mxu1 }
 0x395   :  { %v2884_v29 = vpop.f32.mrb[17].mxu1 }
 0x396   :  { %v2885_v30 = vadd.f32 %v2884_v29, %v2883_v28  ;;  %v2886_v31 = vpop.f32.mrb[18].mxu1 }
 0x397   :  { %v2887_v32 = vpop.f32.mrb[19].mxu1 }
 0x398   :  { %v2484_v41 = vadd.f32 %v2885_v30, %v1043_v35 }
 0x3b4   :  { %v2905_v38 = vpop.f32.mrb[20].mxu1 }
 0x3b5   :  { %v2906_v40 = vpop.f32.mrb[21].mxu1 }
 0x3b6   :  { %v2907_v42 = vadd.f32 %v2906_v40, %v2905_v38  ;;  %v2908_v43 = vpop.f32.mrb[22].mxu1 }
 0x3b7   :  { %v2909_v44 = vpop.f32.mrb[23].mxu1 }
 0x3b8   :  { %v2524_v16 = vadd.f32 %v2907_v42, %v2484_v41 }
 0x3ba   :  { %3380 = vtanh.f32 %v2524_v16 }
 0x3c4   :  { %v3381_v45 = vpop.eup %3380 }
 0x3c5   :  { %2543 = vst.msk [vmem:[#allocation2 + $0x30] sm:$0xff] %vm2542_vm5, %v3381_v45 }
 0x3f3   :  { %v2442_v47 = vpop.f32.mrb[8].mxu0 }
 0x3f4   :  { %v2915_v48 = vadd.f32 %v2442_v47, %v1035_v23  ;;  %v2444_v49 = vpop.f32.mrb[9].mxu0 }
 0x3f5   :  { %v2916_v50 = vadd.f32 %v2444_v49, %v1039_v46  ;;  %v2446_v51 = vpop.f32.mrb[10].mxu0 }
 0x3f6   :  { %3382 = vtanh.f32 %v2915_v48  ;;  %v2447_v52 = vpop.f32.mrb[11].mxu0 }
 0x3f7   :  { %3384 = vtanh.f32 %v2916_v50 }
 0x400   :  { %v3383_v53 = vpop.eup %3382 }
 0x401   :  { %v3385_v54 = vpop.eup %3384  ;;  %2540 = vst [vmem:[#allocation2 + $0x20] sm:$0xff] %v3383_v53 }
 0x402   :  { %2541 = vst [vmem:[#allocation2 + $0x28] sm:$0xff] %v3385_v54 }
 0x403   :  { %3397 = shalt.err (!%p3394_p4)
}
 0x404   :  { %s3398_s11 = scalar_lea.hbm %s4470_s9, 896 }
 0x405   :  { %p3399_p5 = scmp.ne.s32.totalorder %s4470_s9, %s3398_s11  ;;  %p3402_p6 = scmp.lt.u32.totalorder %s3398_s11, %s4470_s9 }
 0x407   :  { %p3404_p7 = pnand %p3402_p6, %p3399_p5 }
 0x409   :  { %3407 = shalt.err (!%p3404_p7)
}
 0x40a   :  { %2553 = dma.vmem_to_hbm [thread:$0]  %s2551_s8, 896, %s4470_s9, [#allocation3]  }
 0x40b   :  { %3408 = dma.done.wait [#allocation3], 896  }
 0x40c   :  { %3409 = vsyncadd [#allocation3], 4294966400 }
 0x40d   :  { %2557 = vsyncpa [#allocation3], 1 }

</bundles_post_ra>
